<compile_context>
chip_gen: v7x
topology: tpu7x:2x2x1
jax: 0.10.0
libtpu: 0.0.40
codegen_flags: <defaults>
</compile_context>

<pallas_src>
import jax
import jax.numpy as jnp
from jax import lax
from jax.experimental import pallas as pl
from jax.experimental.pallas import tpu as pltpu

EMBED_DIM = 20
RNN_HIDDEN = 64
FC_HIDDEN = 64
VOCAB_SIZE = 100
NUM_GATES = 4
GATE_PAD = 128      # each gate padded to a full 128-lane tile
EMBED_PAD = 128     # embedding (+ bias column) padded to one lane tile
SUBLANE = 8


def _pad_gate_cols(w):
    """(n, 4*H) -> (n, 4*GATE_PAD): zero-pad each gate block to 128 lanes."""
    n = w.shape[0]
    w4 = w.reshape(n, NUM_GATES, RNN_HIDDEN)
    out = jnp.zeros((n, NUM_GATES, GATE_PAD), w.dtype)
    out = out.at[:, :, :RNN_HIDDEN].set(w4)
    return out.reshape(n, NUM_GATES * GATE_PAD)


def rnn_kernel(maxlen_ref, len_ref, x_ref, wih_ref, whh_ref,
               w1_ref, b1_ref, w2_ref, b2_ref, out_ref,
               h_scr, c_scr, gx_scr):
    """maxlen_ref: (1,) i32 SMEM (scalar prefetch); len_ref: (B,1) i32;
    x_ref: (1, tT*B, EMBED_PAD) bf16 embeddings for this time tile;
    wih_ref: (EMBED_PAD, 4*GP) bf16 (bias folded into row EMBED_DIM);
    whh_ref: (GP, 4*GP) bf16; h_scr/c_scr: (B, GP) f32 state carried across
    the time grid; gx_scr: (tT*B, 4*GP) f32 per-tile gate pre-activations.
    Pad lanes (64:128) of every gate stay exactly zero."""
    GP = GATE_PAD
    B = h_scr.shape[0]
    tT = x_ref.shape[1] // B
    ti = pl.program_id(0)

    @pl.when(ti == 0)
    def _init():
        h_scr[...] = jnp.zeros_like(h_scr)
        c_scr[...] = jnp.zeros_like(c_scr)

    # Skip compute for trailing time tiles where every sequence has ended.
    @pl.when(ti * tT < maxlen_ref[0])
    def _tile():
        # x-projection for the whole tile: ONE batched bf16 MXU op, off the
        # serial recurrence critical path.  Bias is applied via the constant-1
        # embedding column hitting row EMBED_DIM of W_ih.
        gx_scr[...] = jnp.dot(x_ref[0], wih_ref[...],
                              preferred_element_type=jnp.float32)

        lengths = len_ref[...]          # (B, 1) int32 -- a single vreg

        def step(s, carry):
            h, c = carry
            t = ti * tT + s
            row = pl.multiple_of(s * B, B)
            # whh_ref is read inside the step so the 128 KiB weight block is
            # streamed from VMEM by the matmul instead of pinned in vregs
            # across the unrolled loop.
            gates = gx_scr[pl.ds(row, B), :] + jnp.dot(
                h.astype(jnp.bfloat16), whh_ref[...],
                preferred_element_type=jnp.float32)
            i = jax.nn.sigmoid(gates[:, 0 * GP:1 * GP])
            f = jax.nn.sigmoid(gates[:, 1 * GP:2 * GP])
            g = jnp.tanh(gates[:, 2 * GP:3 * GP])
            o = jax.nn.sigmoid(gates[:, 3 * GP:4 * GP])
            c_new = f * c + i * g
            h_new = o * jnp.tanh(c_new)
            # packed-sequence semantics: only update state while t < length[b]
            upd = t < lengths           # (B, 1) bool, broadcasts over lanes
            return jnp.where(upd, h_new, h), jnp.where(upd, c_new, c)

        h, c = lax.fori_loop(0, tT, step, (h_scr[...], c_scr[...]),
                             unroll=min(tT, 8))
        h_scr[...] = h
        c_scr[...] = c

    @pl.when(ti == pl.num_programs(0) - 1)
    def _final():
        # hidden[-1] of the packed LSTM -> fc1 -> ReLU -> fc2 -> sigmoid
        y = jnp.dot(h_scr[...], w1_ref[...],
                    preferred_element_type=jnp.float32) + b1_ref[...]
        y = jnp.maximum(y, 0.0)
        y = jnp.dot(y, w2_ref[...],
                    preferred_element_type=jnp.float32) + b2_ref[...]
        out_ref[...] = jax.nn.sigmoid(y)


def init_params(key):
    """Deterministic init matching the PyTorch module's parameter shapes."""
    ks = jax.random.split(key, 9)
    k_lstm = 1.0 / jnp.sqrt(jnp.float32(RNN_HIDDEN))
    k_fc1 = 1.0 / jnp.sqrt(jnp.float32(RNN_HIDDEN))
    k_fc2 = 1.0 / jnp.sqrt(jnp.float32(FC_HIDDEN))

    emb = jax.random.normal(ks[0], (VOCAB_SIZE, EMBED_DIM), jnp.float32)
    emb = emb.at[0].set(0.0)  # padding_idx=0

    # LSTM weights stored transposed: (in, 4H) / (H, 4H); biases summed.
    w_ih = jax.random.uniform(ks[1], (EMBED_DIM, 4 * RNN_HIDDEN),
                              jnp.float32, -k_lstm, k_lstm)
    w_hh = jax.random.uniform(ks[2], (RNN_HIDDEN, 4 * RNN_HIDDEN),
                              jnp.float32, -k_lstm, k_lstm)
    b_ih = jax.random.uniform(ks[3], (4 * RNN_HIDDEN,),
                              jnp.float32, -k_lstm, k_lstm)
    b_hh = jax.random.uniform(ks[4], (4 * RNN_HIDDEN,),
                              jnp.float32, -k_lstm, k_lstm)
    b = (b_ih + b_hh).reshape(1, 4 * RNN_HIDDEN)

    w1 = jax.random.uniform(ks[5], (RNN_HIDDEN, FC_HIDDEN),
                            jnp.float32, -k_fc1, k_fc1)
    b1 = jax.random.uniform(ks[6], (1, FC_HIDDEN), jnp.float32, -k_fc1, k_fc1)
    w2 = jax.random.uniform(ks[7], (FC_HIDDEN, 1), jnp.float32, -k_fc2, k_fc2)
    b2 = jax.random.uniform(ks[8], (1, 1), jnp.float32, -k_fc2, k_fc2)

    return dict(embedding=emb, w_ih=w_ih, w_hh=w_hh, b=b,
                w1=w1, b1=b1, w2=w2, b2=b2)


def rnn_forward(text, lengths, params, *, time_tile=8):
    """text: (B, T) int32 token ids; lengths: (B,) int32 -> (B, 1) f32 probs."""
    B, T = text.shape
    B_pad = ((B + SUBLANE - 1) // SUBLANE) * SUBLANE
    T_pad = ((T + time_tile - 1) // time_tile) * time_tile
    n_tiles = T_pad // time_tile

    # Augmented embedding table: [embedding | 1 | zero-pad to 128 lanes].
    # The constant-1 column lets the summed LSTM bias live in W_ih row
    # EMBED_DIM, so gx = x_aug @ W_ih_aug already includes the bias.
    emb_aug = jnp.zeros((VOCAB_SIZE, EMBED_PAD), jnp.float32)
    emb_aug = emb_aug.at[:, :EMBED_DIM].set(params["embedding"])
    emb_aug = emb_aug.at[:, EMBED_DIM].set(1.0)

    # Gather embeddings, go time-major, pad T/B, fold each tile's (tT, B)
    # into one sublane axis so the kernel does a single 2-D matmul per tile.
    x = emb_aug[text]                                   # (B, T, EMBED_PAD)
    x = jnp.transpose(x, (1, 0, 2))                     # (T, B, EMBED_PAD)
    x = jnp.pad(x, ((0, T_pad - T), (0, B_pad - B), (0, 0)))
    x = x.reshape(n_tiles, time_tile * B_pad, EMBED_PAD).astype(jnp.bfloat16)

    # W_ih (+ folded bias row) and W_hh: gate blocks padded to 128 lanes, bf16.
    wih_aug = jnp.zeros((EMBED_PAD, NUM_GATES * GATE_PAD), jnp.float32)
    wih_aug = wih_aug.at[:EMBED_DIM].set(_pad_gate_cols(params["w_ih"]))
    wih_aug = wih_aug.at[EMBED_DIM].set(_pad_gate_cols(params["b"])[0])
    wih_aug = wih_aug.astype(jnp.bfloat16)

    whh_pad = jnp.zeros((GATE_PAD, NUM_GATES * GATE_PAD), jnp.float32)
    whh_pad = whh_pad.at[:RNN_HIDDEN].set(_pad_gate_cols(params["w_hh"]))
    whh_pad = whh_pad.astype(jnp.bfloat16)

    w1_pad = jnp.zeros((GATE_PAD, FC_HIDDEN), jnp.float32)
    w1_pad = w1_pad.at[:RNN_HIDDEN].set(params["w1"])

    # Padded batch rows get length 0 -> their state is never updated.
    len2d = jnp.pad(lengths.astype(jnp.int32),
                    (0, B_pad - B)).reshape(B_pad, 1)
    # Scalar-prefetched max length: lets the kernel skip dead time tiles.
    max_len = jnp.max(lengths).astype(jnp.int32).reshape(1)

    grid_spec = pltpu.PrefetchScalarGridSpec(
        num_scalar_prefetch=1,
        grid=(n_tiles,),
        in_specs=[
            pl.BlockSpec((B_pad, 1), lambda t, ml: (0, 0)),            # lengths
            pl.BlockSpec((1, time_tile * B_pad, EMBED_PAD),
                         lambda t, ml: (t, 0, 0)),                     # x tile
            pl.BlockSpec((EMBED_PAD, NUM_GATES * GATE_PAD),
                         lambda t, ml: (0, 0)),                        # W_ih
            pl.BlockSpec((GATE_PAD, NUM_GATES * GATE_PAD),
                         lambda t, ml: (0, 0)),                        # W_hh
            pl.BlockSpec((GATE_PAD, FC_HIDDEN), lambda t, ml: (0, 0)), # w1
            pl.BlockSpec((1, FC_HIDDEN), lambda t, ml: (0, 0)),        # b1
            pl.BlockSpec((FC_HIDDEN, 1), lambda t, ml: (0, 0)),        # w2
            pl.BlockSpec((1, 1), lambda t, ml: (0, 0)),                # b2
        ],
        out_specs=pl.BlockSpec((B_pad, 1), lambda t, ml: (0, 0)),
        scratch_shapes=[
            pltpu.VMEM((B_pad, GATE_PAD), jnp.float32),                      # h
            pltpu.VMEM((B_pad, GATE_PAD), jnp.float32),                      # c
            pltpu.VMEM((time_tile * B_pad, NUM_GATES * GATE_PAD),
                       jnp.float32),                                         # gx
        ],
    )
    # NOTE: constant-index weight inputs could use pipeline_mode=pl.Buffered(1)
    # to drop their second VMEM buffer; not needed at these sizes.
    out = pl.pallas_call(
        rnn_kernel,
        out_shape=jax.ShapeDtypeStruct((B_pad, 1), jnp.float32),
        grid_spec=grid_spec,
        compiler_params=pltpu.CompilerParams(
            dimension_semantics=("arbitrary",),
            vmem_limit_bytes=32 * 1024 * 1024),
    )(max_len, len2d, x, wih_aug, whh_pad, w1_pad, params["b1"],
      params["w2"], params["b2"])
    return out[:B]


def rnn_reference(text, lengths, params):
    """Pure-JAX f32 reference of the PyTorch forward (packed LSTM, hidden[-1])."""
    x = params["embedding"][text]            # (B, T, E)
    B, T, _ = x.shape
    H = RNN_HIDDEN

    def cell(carry, t):
        h, c = carry
        gates = (x[:, t, :] @ params["w_ih"] + h @ params["w_hh"]
                 + params["b"])
        i = jax.nn.sigmoid(gates[:, 0 * H:1 * H])
        f = jax.nn.sigmoid(gates[:, 1 * H:2 * H])
        g = jnp.tanh(gates[:, 2 * H:3 * H])
        o = jax.nn.sigmoid(gates[:, 3 * H:4 * H])
        c_new = f * c + i * g
        h_new = o * jnp.tanh(c_new)
        m = (t < lengths)[:, None]
        return (jnp.where(m, h_new, h), jnp.where(m, c_new, c)), None

    init = (jnp.zeros((B, H), jnp.float32), jnp.zeros((B, H), jnp.float32))
    (h, _), _ = lax.scan(cell, init, jnp.arange(T))
    y = jnp.maximum(h @ params["w1"] + params["b1"], 0.0)
    return jax.nn.sigmoid(y @ params["w2"] + params["b2"])


if __name__ == "__main__":
    key = jax.random.PRNGKey(0)
    pkey, tkey = jax.random.split(key)
    params = init_params(pkey)

    B, T = 2, 8
    lengths = jnp.array([8, 5], dtype=jnp.int32)
    text = jax.random.randint(tkey, (B, T), 1, VOCAB_SIZE, dtype=jnp.int32)
    # zero-pad past each sequence's length (padding_idx = 0)
    pad_mask = jnp.arange(T)[None, :] < lengths[:, None]
    text = jnp.where(pad_mask, text, 0)

    out = rnn_forward(text, lengths, params)
    jax.block_until_ready(out)
    assert out.shape == (B, 1)

    ref = rnn_reference(text, lengths, params)
    # Tolerance loosened vs. pure-f32: x / W_ih / W_hh are bf16 on the MXU.
    assert jnp.allclose(out, ref, atol=2e-2, rtol=2e-2), (
        f"max diff {float(jnp.max(jnp.abs(out - ref)))}")
    print("KERNEL_OK")
</pallas_src>

<mosaic_0001>
module attributes {stable_mosaic.version = 11 : i64} {
  func.func @rnn_kernel(%arg0: i32, %arg1: memref<1xi32, #tpu.memory_space<smem>>, %arg2: memref<8x1xi32, #tpu.memory_space<vmem>>, %arg3: memref<1x64x128xbf16, #tpu.memory_space<vmem>>, %arg4: memref<128x512xbf16, #tpu.memory_space<vmem>>, %arg5: memref<128x512xbf16, #tpu.memory_space<vmem>>, %arg6: memref<128x64xf32, #tpu.memory_space<vmem>>, %arg7: memref<1x64xf32, #tpu.memory_space<vmem>>, %arg8: memref<64x1xf32, #tpu.memory_space<vmem>>, %arg9: memref<1x1xf32, #tpu.memory_space<vmem>>, %arg10: memref<8x1xf32, #tpu.memory_space<vmem>>, %arg11: memref<8x128xf32, #tpu.memory_space<vmem>>, %arg12: memref<8x128xf32, #tpu.memory_space<vmem>>, %arg13: memref<64x512xf32, #tpu.memory_space<vmem>>) attributes {dimension_semantics = [#tpu.dimension_semantics<arbitrary>], iteration_bounds = array<i64: 1>, scalar_prefetch = 1 : i64, scratch_operands = 3 : i64, tpu.core_type = #tpu.core_type<tc>, window_params = [{pipeline_mode = #tpu.pipeline_mode<synchronous>, transform_indices = @transform_0, window_bounds = array<i64: 8, 1>}, {transform_indices = @transform_1, window_bounds = array<i64: 1, 64, 128>}, {pipeline_mode = #tpu.pipeline_mode<synchronous>, transform_indices = @transform_2, window_bounds = array<i64: 128, 512>}, {pipeline_mode = #tpu.pipeline_mode<synchronous>, transform_indices = @transform_3, window_bounds = array<i64: 128, 512>}, {pipeline_mode = #tpu.pipeline_mode<synchronous>, transform_indices = @transform_4, window_bounds = array<i64: 128, 64>}, {pipeline_mode = #tpu.pipeline_mode<synchronous>, transform_indices = @transform_5, window_bounds = array<i64: 1, 64>}, {pipeline_mode = #tpu.pipeline_mode<synchronous>, transform_indices = @transform_6, window_bounds = array<i64: 64, 1>}, {pipeline_mode = #tpu.pipeline_mode<synchronous>, transform_indices = @transform_7, window_bounds = array<i64: 1, 1>}, {pipeline_mode = #tpu.pipeline_mode<synchronous>, transform_indices = @transform_8, window_bounds = array<i64: 8, 1>}]} {
    %c0_i32 = arith.constant 0 : i32
    %0 = arith.cmpi eq, %arg0, %c0_i32 : i32
    %1 = arith.extui %0 : i1 to i32
    %c0_i32_0 = arith.constant 0 : i32
    %2 = arith.cmpi ne, %1, %c0_i32_0 : i32
    scf.if %2 {
      %cst = arith.constant 0.000000e+00 : f32
      %11 = vector.broadcast %cst : f32 to vector<8x128xf32>
      %c0_4 = arith.constant 0 : index
      %c0_5 = arith.constant 0 : index
      %12 = vector.load %arg11[%c0_4, %c0_5] : memref<8x128xf32, #tpu.memory_space<vmem>>, vector<8x128xf32>
      tpu.vector_store %arg11[%c0_4, %c0_5], %11 {strides = array<i32>} : memref<8x128xf32, #tpu.memory_space<vmem>>, vector<8x128xf32>,
      %cst_6 = arith.constant 0.000000e+00 : f32
      %13 = vector.broadcast %cst_6 : f32 to vector<8x128xf32>
      %c0_7 = arith.constant 0 : index
      %c0_8 = arith.constant 0 : index
      %14 = vector.load %arg12[%c0_7, %c0_8] : memref<8x128xf32, #tpu.memory_space<vmem>>, vector<8x128xf32>
      tpu.vector_store %arg12[%c0_7, %c0_8], %13 {strides = array<i32>} : memref<8x128xf32, #tpu.memory_space<vmem>>, vector<8x128xf32>,
    } else {
    }
    %c8_i32 = arith.constant 8 : i32
    %3 = arith.muli %arg0, %c8_i32 : i32
    %c0 = arith.constant 0 : index
    %4 = memref.load %arg1[%c0] : memref<1xi32, #tpu.memory_space<smem>>
    %5 = arith.cmpi slt, %3, %4 : i32
    %6 = arith.extui %5 : i1 to i32
    %c0_i32_1 = arith.constant 0 : i32
    %7 = arith.cmpi ne, %6, %c0_i32_1 : i32
    scf.if %7 {
      %c0_4 = arith.constant 0 : index
      %c0_5 = arith.constant 0 : index
      %c0_6 = arith.constant 0 : index
      %11 = vector.load %arg3[%c0_4, %c0_5, %c0_6] : memref<1x64x128xbf16, #tpu.memory_space<vmem>>, vector<1x64x128xbf16>
      %12 = vector.shape_cast %11 : vector<1x64x128xbf16> to vector<64x128xbf16>
      %c0_7 = arith.constant 0 : index
      %c0_8 = arith.constant 0 : index
      %13 = vector.load %arg4[%c0_7, %c0_8] : memref<128x512xbf16, #tpu.memory_space<vmem>>, vector<128x512xbf16>
      %cst = arith.constant dense<0.000000e+00> : vector<64x512xf32>
      %14 = tpu.matmul %12, %13, %cst {dimension_numbers = #tpu.dot_dimension_numbers<[1], [0], [0], [1], [0, 0, 1, 1], [], []>} : vector<64x128xbf16>, vector<128x512xbf16>, vector<64x512xf32> -> vector<64x512xf32>
      %c0_9 = arith.constant 0 : index
      %c0_10 = arith.constant 0 : index
      %15 = vector.load %arg13[%c0_9, %c0_10] : memref<64x512xf32, #tpu.memory_space<vmem>>, vector<64x512xf32>
      tpu.vector_store %arg13[%c0_9, %c0_10], %14 {strides = array<i32>} : memref<64x512xf32, #tpu.memory_space<vmem>>, vector<64x512xf32>,
      %c0_11 = arith.constant 0 : index
      %c0_12 = arith.constant 0 : index
      %16 = vector.load %arg2[%c0_11, %c0_12] : memref<8x1xi32, #tpu.memory_space<vmem>>, vector<8x1xi32>
      %c0_13 = arith.constant 0 : index
      %c0_14 = arith.constant 0 : index
      %17 = vector.load %arg11[%c0_13, %c0_14] : memref<8x128xf32, #tpu.memory_space<vmem>>, vector<8x128xf32>
      %c0_15 = arith.constant 0 : index
      %c0_16 = arith.constant 0 : index
      %18 = vector.load %arg12[%c0_15, %c0_16] : memref<8x128xf32, #tpu.memory_space<vmem>>, vector<8x128xf32>
      %c0_i32_17 = arith.constant 0 : i32
      %c8_i32_18 = arith.constant 8 : i32
      %19 = arith.muli %arg0, %c8_i32_18 : i32
      %20 = arith.addi %19, %c0_i32_17 : i32
      %c8_i32_19 = arith.constant 8 : i32
      %21 = arith.muli %c0_i32_17, %c8_i32_19 : i32
      %22 = tpu.assume_multiple %21, 8 : i32
      %23 = arith.index_cast %22 : i32 to index
      %c0_20 = arith.constant 0 : index
      %24 = vector.load %arg13[%23, %c0_20] : memref<64x512xf32, #tpu.memory_space<vmem>>, vector<8x512xf32>
      %25 = arith.truncf %17 : vector<8x128xf32> to vector<8x128xbf16>
      %c0_21 = arith.constant 0 : index
      %c0_22 = arith.constant 0 : index
      %26 = vector.load %arg5[%c0_21, %c0_22] : memref<128x512xbf16, #tpu.memory_space<vmem>>, vector<128x512xbf16>
      %cst_23 = arith.constant dense<0.000000e+00> : vector<8x512xf32>
      %27 = tpu.matmul %25, %26, %cst_23 {dimension_numbers = #tpu.dot_dimension_numbers<[1], [0], [0], [1], [0, 0, 1, 1], [], []>} : vector<8x128xbf16>, vector<128x512xbf16>, vector<8x512xf32> -> vector<8x512xf32>
      %28 = arith.addf %24, %27 : vector<8x512xf32>
      %29 = vector.extract_strided_slice %28 {offsets = [0, 0], sizes = [8, 128], strides = [1, 1]} : vector<8x512xf32> to vector<8x128xf32>
      %30 = arith.negf %29 : vector<8x128xf32>
      %31 = math.exp %30 : vector<8x128xf32>
      %cst_24 = arith.constant 1.000000e+00 : f32
      %32 = vector.broadcast %cst_24 : f32 to vector<8x128xf32>
      %33 = arith.addf %32, %31 : vector<8x128xf32>
      %34 = arith.divf %32, %33 : vector<8x128xf32>
      %35 = vector.extract_strided_slice %28 {offsets = [0, 128], sizes = [8, 128], strides = [1, 1]} : vector<8x512xf32> to vector<8x128xf32>
      %36 = arith.negf %35 : vector<8x128xf32>
      %37 = math.exp %36 : vector<8x128xf32>
      %cst_25 = arith.constant 1.000000e+00 : f32
      %38 = vector.broadcast %cst_25 : f32 to vector<8x128xf32>
      %39 = arith.addf %38, %37 : vector<8x128xf32>
      %40 = arith.divf %38, %39 : vector<8x128xf32>
      %41 = vector.extract_strided_slice %28 {offsets = [0, 256], sizes = [8, 128], strides = [1, 1]} : vector<8x512xf32> to vector<8x128xf32>
      %42 = math.tanh %41 : vector<8x128xf32>
      %43 = vector.extract_strided_slice %28 {offsets = [0, 384], sizes = [8, 128], strides = [1, 1]} : vector<8x512xf32> to vector<8x128xf32>
      %44 = arith.negf %43 : vector<8x128xf32>
      %45 = math.exp %44 : vector<8x128xf32>
      %cst_26 = arith.constant 1.000000e+00 : f32
      %46 = vector.broadcast %cst_26 : f32 to vector<8x128xf32>
      %47 = arith.addf %46, %45 : vector<8x128xf32>
      %48 = arith.divf %46, %47 : vector<8x128xf32>
      %49 = arith.mulf %40, %18 : vector<8x128xf32>
      %50 = arith.mulf %34, %42 : vector<8x128xf32>
      %51 = arith.addf %49, %50 : vector<8x128xf32>
      %52 = math.tanh %51 : vector<8x128xf32>
      %53 = arith.mulf %48, %52 : vector<8x128xf32>
      %54 = vector.broadcast %20 : i32 to vector<8x1xi32>
      %55 = arith.cmpi slt, %54, %16 : vector<8x1xi32>
      %56 = vector.shape_cast %55 : vector<8x1xi1> to vector<8x1xi1>
      %57 = vector.broadcast %56 : vector<8x1xi1> to vector<8x128xi1>
      %58 = arith.select %57, %53, %17 : vector<8x128xi1>, vector<8x128xf32>
      %59 = vector.shape_cast %55 : vector<8x1xi1> to vector<8x1xi1>
      %60 = vector.broadcast %59 : vector<8x1xi1> to vector<8x128xi1>
      %61 = arith.select %60, %51, %18 : vector<8x128xi1>, vector<8x128xf32>
      %c1_i32 = arith.constant 1 : i32
      %c8_i32_27 = arith.constant 8 : i32
      %62 = arith.muli %arg0, %c8_i32_27 : i32
      %63 = arith.addi %62, %c1_i32 : i32
      %c8_i32_28 = arith.constant 8 : i32
      %64 = arith.muli %c1_i32, %c8_i32_28 : i32
      %65 = tpu.assume_multiple %64, 8 : i32
      %66 = arith.index_cast %65 : i32 to index
      %c0_29 = arith.constant 0 : index
      %67 = vector.load %arg13[%66, %c0_29] : memref<64x512xf32, #tpu.memory_space<vmem>>, vector<8x512xf32>
      %68 = arith.truncf %58 : vector<8x128xf32> to vector<8x128xbf16>
      %c0_30 = arith.constant 0 : index
      %c0_31 = arith.constant 0 : index
      %69 = vector.load %arg5[%c0_30, %c0_31] : memref<128x512xbf16, #tpu.memory_space<vmem>>, vector<128x512xbf16>
      %cst_32 = arith.constant dense<0.000000e+00> : vector<8x512xf32>
      %70 = tpu.matmul %68, %69, %cst_32 {dimension_numbers = #tpu.dot_dimension_numbers<[1], [0], [0], [1], [0, 0, 1, 1], [], []>} : vector<8x128xbf16>, vector<128x512xbf16>, vector<8x512xf32> -> vector<8x512xf32>
      %71 = arith.addf %67, %70 : vector<8x512xf32>
      %72 = vector.extract_strided_slice %71 {offsets = [0, 0], sizes = [8, 128], strides = [1, 1]} : vector<8x512xf32> to vector<8x128xf32>
      %73 = arith.negf %72 : vector<8x128xf32>
      %74 = math.exp %73 : vector<8x128xf32>
      %cst_33 = arith.constant 1.000000e+00 : f32
      %75 = vector.broadcast %cst_33 : f32 to vector<8x128xf32>
      %76 = arith.addf %75, %74 : vector<8x128xf32>
      %77 = arith.divf %75, %76 : vector<8x128xf32>
      %78 = vector.extract_strided_slice %71 {offsets = [0, 128], sizes = [8, 128], strides = [1, 1]} : vector<8x512xf32> to vector<8x128xf32>
      %79 = arith.negf %78 : vector<8x128xf32>
      %80 = math.exp %79 : vector<8x128xf32>
      %cst_34 = arith.constant 1.000000e+00 : f32
      %81 = vector.broadcast %cst_34 : f32 to vector<8x128xf32>
      %82 = arith.addf %81, %80 : vector<8x128xf32>
      %83 = arith.divf %81, %82 : vector<8x128xf32>
      %84 = vector.extract_strided_slice %71 {offsets = [0, 256], sizes = [8, 128], strides = [1, 1]} : vector<8x512xf32> to vector<8x128xf32>
      %85 = math.tanh %84 : vector<8x128xf32>
      %86 = vector.extract_strided_slice %71 {offsets = [0, 384], sizes = [8, 128], strides = [1, 1]} : vector<8x512xf32> to vector<8x128xf32>
      %87 = arith.negf %86 : vector<8x128xf32>
      %88 = math.exp %87 : vector<8x128xf32>
      %cst_35 = arith.constant 1.000000e+00 : f32
      %89 = vector.broadcast %cst_35 : f32 to vector<8x128xf32>
      %90 = arith.addf %89, %88 : vector<8x128xf32>
      %91 = arith.divf %89, %90 : vector<8x128xf32>
      %92 = arith.mulf %83, %61 : vector<8x128xf32>
      %93 = arith.mulf %77, %85 : vector<8x128xf32>
      %94 = arith.addf %92, %93 : vector<8x128xf32>
      %95 = math.tanh %94 : vector<8x128xf32>
      %96 = arith.mulf %91, %95 : vector<8x128xf32>
      %97 = vector.broadcast %63 : i32 to vector<8x1xi32>
      %98 = arith.cmpi slt, %97, %16 : vector<8x1xi32>
      %99 = vector.shape_cast %98 : vector<8x1xi1> to vector<8x1xi1>
      %100 = vector.broadcast %99 : vector<8x1xi1> to vector<8x128xi1>
      %101 = arith.select %100, %96, %58 : vector<8x128xi1>, vector<8x128xf32>
      %102 = vector.shape_cast %98 : vector<8x1xi1> to vector<8x1xi1>
      %103 = vector.broadcast %102 : vector<8x1xi1> to vector<8x128xi1>
      %104 = arith.select %103, %94, %61 : vector<8x128xi1>, vector<8x128xf32>
      %c2_i32 = arith.constant 2 : i32
      %c8_i32_36 = arith.constant 8 : i32
      %105 = arith.muli %arg0, %c8_i32_36 : i32
      %106 = arith.addi %105, %c2_i32 : i32
      %c8_i32_37 = arith.constant 8 : i32
      %107 = arith.muli %c2_i32, %c8_i32_37 : i32
      %108 = tpu.assume_multiple %107, 8 : i32
      %109 = arith.index_cast %108 : i32 to index
      %c0_38 = arith.constant 0 : index
      %110 = vector.load %arg13[%109, %c0_38] : memref<64x512xf32, #tpu.memory_space<vmem>>, vector<8x512xf32>
      %111 = arith.truncf %101 : vector<8x128xf32> to vector<8x128xbf16>
      %c0_39 = arith.constant 0 : index
      %c0_40 = arith.constant 0 : index
      %112 = vector.load %arg5[%c0_39, %c0_40] : memref<128x512xbf16, #tpu.memory_space<vmem>>, vector<128x512xbf16>
      %cst_41 = arith.constant dense<0.000000e+00> : vector<8x512xf32>
      %113 = tpu.matmul %111, %112, %cst_41 {dimension_numbers = #tpu.dot_dimension_numbers<[1], [0], [0], [1], [0, 0, 1, 1], [], []>} : vector<8x128xbf16>, vector<128x512xbf16>, vector<8x512xf32> -> vector<8x512xf32>
      %114 = arith.addf %110, %113 : vector<8x512xf32>
      %115 = vector.extract_strided_slice %114 {offsets = [0, 0], sizes = [8, 128], strides = [1, 1]} : vector<8x512xf32> to vector<8x128xf32>
      %116 = arith.negf %115 : vector<8x128xf32>
      %117 = math.exp %116 : vector<8x128xf32>
      %cst_42 = arith.constant 1.000000e+00 : f32
      %118 = vector.broadcast %cst_42 : f32 to vector<8x128xf32>
      %119 = arith.addf %118, %117 : vector<8x128xf32>
      %120 = arith.divf %118, %119 : vector<8x128xf32>
      %121 = vector.extract_strided_slice %114 {offsets = [0, 128], sizes = [8, 128], strides = [1, 1]} : vector<8x512xf32> to vector<8x128xf32>
      %122 = arith.negf %121 : vector<8x128xf32>
      %123 = math.exp %122 : vector<8x128xf32>
      %cst_43 = arith.constant 1.000000e+00 : f32
      %124 = vector.broadcast %cst_43 : f32 to vector<8x128xf32>
      %125 = arith.addf %124, %123 : vector<8x128xf32>
      %126 = arith.divf %124, %125 : vector<8x128xf32>
      %127 = vector.extract_strided_slice %114 {offsets = [0, 256], sizes = [8, 128], strides = [1, 1]} : vector<8x512xf32> to vector<8x128xf32>
      %128 = math.tanh %127 : vector<8x128xf32>
      %129 = vector.extract_strided_slice %114 {offsets = [0, 384], sizes = [8, 128], strides = [1, 1]} : vector<8x512xf32> to vector<8x128xf32>
      %130 = arith.negf %129 : vector<8x128xf32>
      %131 = math.exp %130 : vector<8x128xf32>
      %cst_44 = arith.constant 1.000000e+00 : f32
      %132 = vector.broadcast %cst_44 : f32 to vector<8x128xf32>
      %133 = arith.addf %132, %131 : vector<8x128xf32>
      %134 = arith.divf %132, %133 : vector<8x128xf32>
      %135 = arith.mulf %126, %104 : vector<8x128xf32>
      %136 = arith.mulf %120, %128 : vector<8x128xf32>
      %137 = arith.addf %135, %136 : vector<8x128xf32>
      %138 = math.tanh %137 : vector<8x128xf32>
      %139 = arith.mulf %134, %138 : vector<8x128xf32>
      %140 = vector.broadcast %106 : i32 to vector<8x1xi32>
      %141 = arith.cmpi slt, %140, %16 : vector<8x1xi32>
      %142 = vector.shape_cast %141 : vector<8x1xi1> to vector<8x1xi1>
      %143 = vector.broadcast %142 : vector<8x1xi1> to vector<8x128xi1>
      %144 = arith.select %143, %139, %101 : vector<8x128xi1>, vector<8x128xf32>
      %145 = vector.shape_cast %141 : vector<8x1xi1> to vector<8x1xi1>
      %146 = vector.broadcast %145 : vector<8x1xi1> to vector<8x128xi1>
      %147 = arith.select %146, %137, %104 : vector<8x128xi1>, vector<8x128xf32>
      %c3_i32 = arith.constant 3 : i32
      %c8_i32_45 = arith.constant 8 : i32
      %148 = arith.muli %arg0, %c8_i32_45 : i32
      %149 = arith.addi %148, %c3_i32 : i32
      %c8_i32_46 = arith.constant 8 : i32
      %150 = arith.muli %c3_i32, %c8_i32_46 : i32
      %151 = tpu.assume_multiple %150, 8 : i32
      %152 = arith.index_cast %151 : i32 to index
      %c0_47 = arith.constant 0 : index
      %153 = vector.load %arg13[%152, %c0_47] : memref<64x512xf32, #tpu.memory_space<vmem>>, vector<8x512xf32>
      %154 = arith.truncf %144 : vector<8x128xf32> to vector<8x128xbf16>
      %c0_48 = arith.constant 0 : index
      %c0_49 = arith.constant 0 : index
      %155 = vector.load %arg5[%c0_48, %c0_49] : memref<128x512xbf16, #tpu.memory_space<vmem>>, vector<128x512xbf16>
      %cst_50 = arith.constant dense<0.000000e+00> : vector<8x512xf32>
      %156 = tpu.matmul %154, %155, %cst_50 {dimension_numbers = #tpu.dot_dimension_numbers<[1], [0], [0], [1], [0, 0, 1, 1], [], []>} : vector<8x128xbf16>, vector<128x512xbf16>, vector<8x512xf32> -> vector<8x512xf32>
      %157 = arith.addf %153, %156 : vector<8x512xf32>
      %158 = vector.extract_strided_slice %157 {offsets = [0, 0], sizes = [8, 128], strides = [1, 1]} : vector<8x512xf32> to vector<8x128xf32>
      %159 = arith.negf %158 : vector<8x128xf32>
      %160 = math.exp %159 : vector<8x128xf32>
      %cst_51 = arith.constant 1.000000e+00 : f32
      %161 = vector.broadcast %cst_51 : f32 to vector<8x128xf32>
      %162 = arith.addf %161, %160 : vector<8x128xf32>
      %163 = arith.divf %161, %162 : vector<8x128xf32>
      %164 = vector.extract_strided_slice %157 {offsets = [0, 128], sizes = [8, 128], strides = [1, 1]} : vector<8x512xf32> to vector<8x128xf32>
      %165 = arith.negf %164 : vector<8x128xf32>
      %166 = math.exp %165 : vector<8x128xf32>
      %cst_52 = arith.constant 1.000000e+00 : f32
      %167 = vector.broadcast %cst_52 : f32 to vector<8x128xf32>
      %168 = arith.addf %167, %166 : vector<8x128xf32>
      %169 = arith.divf %167, %168 : vector<8x128xf32>
      %170 = vector.extract_strided_slice %157 {offsets = [0, 256], sizes = [8, 128], strides = [1, 1]} : vector<8x512xf32> to vector<8x128xf32>
      %171 = math.tanh %170 : vector<8x128xf32>
      %172 = vector.extract_strided_slice %157 {offsets = [0, 384], sizes = [8, 128], strides = [1, 1]} : vector<8x512xf32> to vector<8x128xf32>
      %173 = arith.negf %172 : vector<8x128xf32>
      %174 = math.exp %173 : vector<8x128xf32>
      %cst_53 = arith.constant 1.000000e+00 : f32
      %175 = vector.broadcast %cst_53 : f32 to vector<8x128xf32>
      %176 = arith.addf %175, %174 : vector<8x128xf32>
      %177 = arith.divf %175, %176 : vector<8x128xf32>
      %178 = arith.mulf %169, %147 : vector<8x128xf32>
      %179 = arith.mulf %163, %171 : vector<8x128xf32>
      %180 = arith.addf %178, %179 : vector<8x128xf32>
      %181 = math.tanh %180 : vector<8x128xf32>
      %182 = arith.mulf %177, %181 : vector<8x128xf32>
      %183 = vector.broadcast %149 : i32 to vector<8x1xi32>
      %184 = arith.cmpi slt, %183, %16 : vector<8x1xi32>
      %185 = vector.shape_cast %184 : vector<8x1xi1> to vector<8x1xi1>
      %186 = vector.broadcast %185 : vector<8x1xi1> to vector<8x128xi1>
      %187 = arith.select %186, %182, %144 : vector<8x128xi1>, vector<8x128xf32>
      %188 = vector.shape_cast %184 : vector<8x1xi1> to vector<8x1xi1>
      %189 = vector.broadcast %188 : vector<8x1xi1> to vector<8x128xi1>
      %190 = arith.select %189, %180, %147 : vector<8x128xi1>, vector<8x128xf32>
      %c4_i32 = arith.constant 4 : i32
      %c8_i32_54 = arith.constant 8 : i32
      %191 = arith.muli %arg0, %c8_i32_54 : i32
      %192 = arith.addi %191, %c4_i32 : i32
      %c8_i32_55 = arith.constant 8 : i32
      %193 = arith.muli %c4_i32, %c8_i32_55 : i32
      %194 = tpu.assume_multiple %193, 8 : i32
      %195 = arith.index_cast %194 : i32 to index
      %c0_56 = arith.constant 0 : index
      %196 = vector.load %arg13[%195, %c0_56] : memref<64x512xf32, #tpu.memory_space<vmem>>, vector<8x512xf32>
      %197 = arith.truncf %187 : vector<8x128xf32> to vector<8x128xbf16>
      %c0_57 = arith.constant 0 : index
      %c0_58 = arith.constant 0 : index
      %198 = vector.load %arg5[%c0_57, %c0_58] : memref<128x512xbf16, #tpu.memory_space<vmem>>, vector<128x512xbf16>
      %cst_59 = arith.constant dense<0.000000e+00> : vector<8x512xf32>
      %199 = tpu.matmul %197, %198, %cst_59 {dimension_numbers = #tpu.dot_dimension_numbers<[1], [0], [0], [1], [0, 0, 1, 1], [], []>} : vector<8x128xbf16>, vector<128x512xbf16>, vector<8x512xf32> -> vector<8x512xf32>
      %200 = arith.addf %196, %199 : vector<8x512xf32>
      %201 = vector.extract_strided_slice %200 {offsets = [0, 0], sizes = [8, 128], strides = [1, 1]} : vector<8x512xf32> to vector<8x128xf32>
      %202 = arith.negf %201 : vector<8x128xf32>
      %203 = math.exp %202 : vector<8x128xf32>
      %cst_60 = arith.constant 1.000000e+00 : f32
      %204 = vector.broadcast %cst_60 : f32 to vector<8x128xf32>
      %205 = arith.addf %204, %203 : vector<8x128xf32>
      %206 = arith.divf %204, %205 : vector<8x128xf32>
      %207 = vector.extract_strided_slice %200 {offsets = [0, 128], sizes = [8, 128], strides = [1, 1]} : vector<8x512xf32> to vector<8x128xf32>
      %208 = arith.negf %207 : vector<8x128xf32>
      %209 = math.exp %208 : vector<8x128xf32>
      %cst_61 = arith.constant 1.000000e+00 : f32
      %210 = vector.broadcast %cst_61 : f32 to vector<8x128xf32>
      %211 = arith.addf %210, %209 : vector<8x128xf32>
      %212 = arith.divf %210, %211 : vector<8x128xf32>
      %213 = vector.extract_strided_slice %200 {offsets = [0, 256], sizes = [8, 128], strides = [1, 1]} : vector<8x512xf32> to vector<8x128xf32>
      %214 = math.tanh %213 : vector<8x128xf32>
      %215 = vector.extract_strided_slice %200 {offsets = [0, 384], sizes = [8, 128], strides = [1, 1]} : vector<8x512xf32> to vector<8x128xf32>
      %216 = arith.negf %215 : vector<8x128xf32>
      %217 = math.exp %216 : vector<8x128xf32>
      %cst_62 = arith.constant 1.000000e+00 : f32
      %218 = vector.broadcast %cst_62 : f32 to vector<8x128xf32>
      %219 = arith.addf %218, %217 : vector<8x128xf32>
      %220 = arith.divf %218, %219 : vector<8x128xf32>
      %221 = arith.mulf %212, %190 : vector<8x128xf32>
      %222 = arith.mulf %206, %214 : vector<8x128xf32>
      %223 = arith.addf %221, %222 : vector<8x128xf32>
      %224 = math.tanh %223 : vector<8x128xf32>
      %225 = arith.mulf %220, %224 : vector<8x128xf32>
      %226 = vector.broadcast %192 : i32 to vector<8x1xi32>
      %227 = arith.cmpi slt, %226, %16 : vector<8x1xi32>
      %228 = vector.shape_cast %227 : vector<8x1xi1> to vector<8x1xi1>
      %229 = vector.broadcast %228 : vector<8x1xi1> to vector<8x128xi1>
      %230 = arith.select %229, %225, %187 : vector<8x128xi1>, vector<8x128xf32>
      %231 = vector.shape_cast %227 : vector<8x1xi1> to vector<8x1xi1>
      %232 = vector.broadcast %231 : vector<8x1xi1> to vector<8x128xi1>
      %233 = arith.select %232, %223, %190 : vector<8x128xi1>, vector<8x128xf32>
      %c5_i32 = arith.constant 5 : i32
      %c8_i32_63 = arith.constant 8 : i32
      %234 = arith.muli %arg0, %c8_i32_63 : i32
      %235 = arith.addi %234, %c5_i32 : i32
      %c8_i32_64 = arith.constant 8 : i32
      %236 = arith.muli %c5_i32, %c8_i32_64 : i32
      %237 = tpu.assume_multiple %236, 8 : i32
      %238 = arith.index_cast %237 : i32 to index
      %c0_65 = arith.constant 0 : index
      %239 = vector.load %arg13[%238, %c0_65] : memref<64x512xf32, #tpu.memory_space<vmem>>, vector<8x512xf32>
      %240 = arith.truncf %230 : vector<8x128xf32> to vector<8x128xbf16>
      %c0_66 = arith.constant 0 : index
      %c0_67 = arith.constant 0 : index
      %241 = vector.load %arg5[%c0_66, %c0_67] : memref<128x512xbf16, #tpu.memory_space<vmem>>, vector<128x512xbf16>
      %cst_68 = arith.constant dense<0.000000e+00> : vector<8x512xf32>
      %242 = tpu.matmul %240, %241, %cst_68 {dimension_numbers = #tpu.dot_dimension_numbers<[1], [0], [0], [1], [0, 0, 1, 1], [], []>} : vector<8x128xbf16>, vector<128x512xbf16>, vector<8x512xf32> -> vector<8x512xf32>
      %243 = arith.addf %239, %242 : vector<8x512xf32>
      %244 = vector.extract_strided_slice %243 {offsets = [0, 0], sizes = [8, 128], strides = [1, 1]} : vector<8x512xf32> to vector<8x128xf32>
      %245 = arith.negf %244 : vector<8x128xf32>
      %246 = math.exp %245 : vector<8x128xf32>
      %cst_69 = arith.constant 1.000000e+00 : f32
      %247 = vector.broadcast %cst_69 : f32 to vector<8x128xf32>
      %248 = arith.addf %247, %246 : vector<8x128xf32>
      %249 = arith.divf %247, %248 : vector<8x128xf32>
      %250 = vector.extract_strided_slice %243 {offsets = [0, 128], sizes = [8, 128], strides = [1, 1]} : vector<8x512xf32> to vector<8x128xf32>
      %251 = arith.negf %250 : vector<8x128xf32>
      %252 = math.exp %251 : vector<8x128xf32>
      %cst_70 = arith.constant 1.000000e+00 : f32
      %253 = vector.broadcast %cst_70 : f32 to vector<8x128xf32>
      %254 = arith.addf %253, %252 : vector<8x128xf32>
      %255 = arith.divf %253, %254 : vector<8x128xf32>
      %256 = vector.extract_strided_slice %243 {offsets = [0, 256], sizes = [8, 128], strides = [1, 1]} : vector<8x512xf32> to vector<8x128xf32>
      %257 = math.tanh %256 : vector<8x128xf32>
      %258 = vector.extract_strided_slice %243 {offsets = [0, 384], sizes = [8, 128], strides = [1, 1]} : vector<8x512xf32> to vector<8x128xf32>
      %259 = arith.negf %258 : vector<8x128xf32>
      %260 = math.exp %259 : vector<8x128xf32>
      %cst_71 = arith.constant 1.000000e+00 : f32
      %261 = vector.broadcast %cst_71 : f32 to vector<8x128xf32>
      %262 = arith.addf %261, %260 : vector<8x128xf32>
      %263 = arith.divf %261, %262 : vector<8x128xf32>
      %264 = arith.mulf %255, %233 : vector<8x128xf32>
      %265 = arith.mulf %249, %257 : vector<8x128xf32>
      %266 = arith.addf %264, %265 : vector<8x128xf32>
      %267 = math.tanh %266 : vector<8x128xf32>
      %268 = arith.mulf %263, %267 : vector<8x128xf32>
      %269 = vector.broadcast %235 : i32 to vector<8x1xi32>
      %270 = arith.cmpi slt, %269, %16 : vector<8x1xi32>
      %271 = vector.shape_cast %270 : vector<8x1xi1> to vector<8x1xi1>
      %272 = vector.broadcast %271 : vector<8x1xi1> to vector<8x128xi1>
      %273 = arith.select %272, %268, %230 : vector<8x128xi1>, vector<8x128xf32>
      %274 = vector.shape_cast %270 : vector<8x1xi1> to vector<8x1xi1>
      %275 = vector.broadcast %274 : vector<8x1xi1> to vector<8x128xi1>
      %276 = arith.select %275, %266, %233 : vector<8x128xi1>, vector<8x128xf32>
      %c6_i32 = arith.constant 6 : i32
      %c8_i32_72 = arith.constant 8 : i32
      %277 = arith.muli %arg0, %c8_i32_72 : i32
      %278 = arith.addi %277, %c6_i32 : i32
      %c8_i32_73 = arith.constant 8 : i32
      %279 = arith.muli %c6_i32, %c8_i32_73 : i32
      %280 = tpu.assume_multiple %279, 8 : i32
      %281 = arith.index_cast %280 : i32 to index
      %c0_74 = arith.constant 0 : index
      %282 = vector.load %arg13[%281, %c0_74] : memref<64x512xf32, #tpu.memory_space<vmem>>, vector<8x512xf32>
      %283 = arith.truncf %273 : vector<8x128xf32> to vector<8x128xbf16>
      %c0_75 = arith.constant 0 : index
      %c0_76 = arith.constant 0 : index
      %284 = vector.load %arg5[%c0_75, %c0_76] : memref<128x512xbf16, #tpu.memory_space<vmem>>, vector<128x512xbf16>
      %cst_77 = arith.constant dense<0.000000e+00> : vector<8x512xf32>
      %285 = tpu.matmul %283, %284, %cst_77 {dimension_numbers = #tpu.dot_dimension_numbers<[1], [0], [0], [1], [0, 0, 1, 1], [], []>} : vector<8x128xbf16>, vector<128x512xbf16>, vector<8x512xf32> -> vector<8x512xf32>
      %286 = arith.addf %282, %285 : vector<8x512xf32>
      %287 = vector.extract_strided_slice %286 {offsets = [0, 0], sizes = [8, 128], strides = [1, 1]} : vector<8x512xf32> to vector<8x128xf32>
      %288 = arith.negf %287 : vector<8x128xf32>
      %289 = math.exp %288 : vector<8x128xf32>
      %cst_78 = arith.constant 1.000000e+00 : f32
      %290 = vector.broadcast %cst_78 : f32 to vector<8x128xf32>
      %291 = arith.addf %290, %289 : vector<8x128xf32>
      %292 = arith.divf %290, %291 : vector<8x128xf32>
      %293 = vector.extract_strided_slice %286 {offsets = [0, 128], sizes = [8, 128], strides = [1, 1]} : vector<8x512xf32> to vector<8x128xf32>
      %294 = arith.negf %293 : vector<8x128xf32>
      %295 = math.exp %294 : vector<8x128xf32>
      %cst_79 = arith.constant 1.000000e+00 : f32
      %296 = vector.broadcast %cst_79 : f32 to vector<8x128xf32>
      %297 = arith.addf %296, %295 : vector<8x128xf32>
      %298 = arith.divf %296, %297 : vector<8x128xf32>
      %299 = vector.extract_strided_slice %286 {offsets = [0, 256], sizes = [8, 128], strides = [1, 1]} : vector<8x512xf32> to vector<8x128xf32>
      %300 = math.tanh %299 : vector<8x128xf32>
      %301 = vector.extract_strided_slice %286 {offsets = [0, 384], sizes = [8, 128], strides = [1, 1]} : vector<8x512xf32> to vector<8x128xf32>
      %302 = arith.negf %301 : vector<8x128xf32>
      %303 = math.exp %302 : vector<8x128xf32>
      %cst_80 = arith.constant 1.000000e+00 : f32
      %304 = vector.broadcast %cst_80 : f32 to vector<8x128xf32>
      %305 = arith.addf %304, %303 : vector<8x128xf32>
      %306 = arith.divf %304, %305 : vector<8x128xf32>
      %307 = arith.mulf %298, %276 : vector<8x128xf32>
      %308 = arith.mulf %292, %300 : vector<8x128xf32>
      %309 = arith.addf %307, %308 : vector<8x128xf32>
      %310 = math.tanh %309 : vector<8x128xf32>
      %311 = arith.mulf %306, %310 : vector<8x128xf32>
      %312 = vector.broadcast %278 : i32 to vector<8x1xi32>
      %313 = arith.cmpi slt, %312, %16 : vector<8x1xi32>
      %314 = vector.shape_cast %313 : vector<8x1xi1> to vector<8x1xi1>
      %315 = vector.broadcast %314 : vector<8x1xi1> to vector<8x128xi1>
      %316 = arith.select %315, %311, %273 : vector<8x128xi1>, vector<8x128xf32>
      %317 = vector.shape_cast %313 : vector<8x1xi1> to vector<8x1xi1>
      %318 = vector.broadcast %317 : vector<8x1xi1> to vector<8x128xi1>
      %319 = arith.select %318, %309, %276 : vector<8x128xi1>, vector<8x128xf32>
      %c7_i32 = arith.constant 7 : i32
      %c8_i32_81 = arith.constant 8 : i32
      %320 = arith.muli %arg0, %c8_i32_81 : i32
      %321 = arith.addi %320, %c7_i32 : i32
      %c8_i32_82 = arith.constant 8 : i32
      %322 = arith.muli %c7_i32, %c8_i32_82 : i32
      %323 = tpu.assume_multiple %322, 8 : i32
      %324 = arith.index_cast %323 : i32 to index
      %c0_83 = arith.constant 0 : index
      %325 = vector.load %arg13[%324, %c0_83] : memref<64x512xf32, #tpu.memory_space<vmem>>, vector<8x512xf32>
      %326 = arith.truncf %316 : vector<8x128xf32> to vector<8x128xbf16>
      %c0_84 = arith.constant 0 : index
      %c0_85 = arith.constant 0 : index
      %327 = vector.load %arg5[%c0_84, %c0_85] : memref<128x512xbf16, #tpu.memory_space<vmem>>, vector<128x512xbf16>
      %cst_86 = arith.constant dense<0.000000e+00> : vector<8x512xf32>
      %328 = tpu.matmul %326, %327, %cst_86 {dimension_numbers = #tpu.dot_dimension_numbers<[1], [0], [0], [1], [0, 0, 1, 1], [], []>} : vector<8x128xbf16>, vector<128x512xbf16>, vector<8x512xf32> -> vector<8x512xf32>
      %329 = arith.addf %325, %328 : vector<8x512xf32>
      %330 = vector.extract_strided_slice %329 {offsets = [0, 0], sizes = [8, 128], strides = [1, 1]} : vector<8x512xf32> to vector<8x128xf32>
      %331 = arith.negf %330 : vector<8x128xf32>
      %332 = math.exp %331 : vector<8x128xf32>
      %cst_87 = arith.constant 1.000000e+00 : f32
      %333 = vector.broadcast %cst_87 : f32 to vector<8x128xf32>
      %334 = arith.addf %333, %332 : vector<8x128xf32>
      %335 = arith.divf %333, %334 : vector<8x128xf32>
      %336 = vector.extract_strided_slice %329 {offsets = [0, 128], sizes = [8, 128], strides = [1, 1]} : vector<8x512xf32> to vector<8x128xf32>
      %337 = arith.negf %336 : vector<8x128xf32>
      %338 = math.exp %337 : vector<8x128xf32>
      %cst_88 = arith.constant 1.000000e+00 : f32
      %339 = vector.broadcast %cst_88 : f32 to vector<8x128xf32>
      %340 = arith.addf %339, %338 : vector<8x128xf32>
      %341 = arith.divf %339, %340 : vector<8x128xf32>
      %342 = vector.extract_strided_slice %329 {offsets = [0, 256], sizes = [8, 128], strides = [1, 1]} : vector<8x512xf32> to vector<8x128xf32>
      %343 = math.tanh %342 : vector<8x128xf32>
      %344 = vector.extract_strided_slice %329 {offsets = [0, 384], sizes = [8, 128], strides = [1, 1]} : vector<8x512xf32> to vector<8x128xf32>
      %345 = arith.negf %344 : vector<8x128xf32>
      %346 = math.exp %345 : vector<8x128xf32>
      %cst_89 = arith.constant 1.000000e+00 : f32
      %347 = vector.broadcast %cst_89 : f32 to vector<8x128xf32>
      %348 = arith.addf %347, %346 : vector<8x128xf32>
      %349 = arith.divf %347, %348 : vector<8x128xf32>
      %350 = arith.mulf %341, %319 : vector<8x128xf32>
      %351 = arith.mulf %335, %343 : vector<8x128xf32>
      %352 = arith.addf %350, %351 : vector<8x128xf32>
      %353 = math.tanh %352 : vector<8x128xf32>
      %354 = arith.mulf %349, %353 : vector<8x128xf32>
      %355 = vector.broadcast %321 : i32 to vector<8x1xi32>
      %356 = arith.cmpi slt, %355, %16 : vector<8x1xi32>
      %357 = vector.shape_cast %356 : vector<8x1xi1> to vector<8x1xi1>
      %358 = vector.broadcast %357 : vector<8x1xi1> to vector<8x128xi1>
      %359 = arith.select %358, %354, %316 : vector<8x128xi1>, vector<8x128xf32>
      %360 = vector.shape_cast %356 : vector<8x1xi1> to vector<8x1xi1>
      %361 = vector.broadcast %360 : vector<8x1xi1> to vector<8x128xi1>
      %362 = arith.select %361, %352, %319 : vector<8x128xi1>, vector<8x128xf32>
      %c8_i32_90 = arith.constant 8 : i32
      %c0_91 = arith.constant 0 : index
      %c0_92 = arith.constant 0 : index
      %363 = vector.load %arg11[%c0_91, %c0_92] : memref<8x128xf32, #tpu.memory_space<vmem>>, vector<8x128xf32>
      tpu.vector_store %arg11[%c0_91, %c0_92], %359 {strides = array<i32>} : memref<8x128xf32, #tpu.memory_space<vmem>>, vector<8x128xf32>,
      %c0_93 = arith.constant 0 : index
      %c0_94 = arith.constant 0 : index
      %364 = vector.load %arg12[%c0_93, %c0_94] : memref<8x128xf32, #tpu.memory_space<vmem>>, vector<8x128xf32>
      tpu.vector_store %arg12[%c0_93, %c0_94], %362 {strides = array<i32>} : memref<8x128xf32, #tpu.memory_space<vmem>>, vector<8x128xf32>,
    } else {
    }
    %c0_i32_2 = arith.constant 0 : i32
    %8 = arith.cmpi eq, %arg0, %c0_i32_2 : i32
    %9 = arith.extui %8 : i1 to i32
    %c0_i32_3 = arith.constant 0 : i32
    %10 = arith.cmpi ne, %9, %c0_i32_3 : i32
    scf.if %10 {
      %c0_4 = arith.constant 0 : index
      %c0_5 = arith.constant 0 : index
      %11 = vector.load %arg11[%c0_4, %c0_5] : memref<8x128xf32, #tpu.memory_space<vmem>>, vector<8x128xf32>
      %c0_6 = arith.constant 0 : index
      %c0_7 = arith.constant 0 : index
      %12 = vector.load %arg6[%c0_6, %c0_7] : memref<128x64xf32, #tpu.memory_space<vmem>>, vector<128x64xf32>
      %cst = arith.constant dense<0.000000e+00> : vector<8x64xf32>
      %13 = tpu.matmul %11, %12, %cst {dimension_numbers = #tpu.dot_dimension_numbers<[1], [0], [0], [1], [0, 0, 1, 1], [], []>} : vector<8x128xf32>, vector<128x64xf32>, vector<8x64xf32> -> vector<8x64xf32>
      %c0_8 = arith.constant 0 : index
      %c0_9 = arith.constant 0 : index
      %14 = vector.load %arg7[%c0_8, %c0_9] : memref<1x64xf32, #tpu.memory_space<vmem>>, vector<1x64xf32>
      %15 = vector.broadcast %14 : vector<1x64xf32> to vector<8x64xf32>
      %16 = arith.addf %13, %15 : vector<8x64xf32>
      %cst_10 = arith.constant 0.000000e+00 : f32
      %17 = vector.broadcast %cst_10 : f32 to vector<8x64xf32>
      %18 = arith.maximumf %16, %17 : vector<8x64xf32>
      %c0_11 = arith.constant 0 : index
      %c0_12 = arith.constant 0 : index
      %19 = vector.load %arg8[%c0_11, %c0_12] : memref<64x1xf32, #tpu.memory_space<vmem>>, vector<64x1xf32>
      %cst_13 = arith.constant dense<0.000000e+00> : vector<8x1xf32>
      %20 = tpu.matmul %18, %19, %cst_13 {dimension_numbers = #tpu.dot_dimension_numbers<[1], [0], [0], [1], [0, 0, 1, 1], [], []>} : vector<8x64xf32>, vector<64x1xf32>, vector<8x1xf32> -> vector<8x1xf32>
      %c0_14 = arith.constant 0 : index
      %c0_15 = arith.constant 0 : index
      %21 = vector.load %arg9[%c0_14, %c0_15] : memref<1x1xf32, #tpu.memory_space<vmem>>, vector<1x1xf32>
      %22 = vector.broadcast %21 : vector<1x1xf32> to vector<8x1xf32>
      %23 = arith.addf %20, %22 : vector<8x1xf32>
      %24 = arith.negf %23 : vector<8x1xf32>
      %25 = math.exp %24 : vector<8x1xf32>
      %cst_16 = arith.constant 1.000000e+00 : f32
      %26 = vector.broadcast %cst_16 : f32 to vector<8x1xf32>
      %27 = arith.addf %26, %25 : vector<8x1xf32>
      %28 = arith.divf %26, %27 : vector<8x1xf32>
      %c0_17 = arith.constant 0 : index
      %c0_18 = arith.constant 0 : index
      %29 = vector.load %arg10[%c0_17, %c0_18] : memref<8x1xf32, #tpu.memory_space<vmem>>, vector<8x1xf32>
      tpu.vector_store %arg10[%c0_17, %c0_18], %28 {strides = array<i32>} : memref<8x1xf32, #tpu.memory_space<vmem>>, vector<8x1xf32>,
    } else {
    }
    return
  }
  func.func @transform_0(%arg0: i32, %arg1: memref<1xi32, #tpu.memory_space<smem>>) -> (i32, i32) {
    %c0_i32 = arith.constant 0 : i32
    %c0_i32_0 = arith.constant 0 : i32
    %c0_i32_1 = arith.constant 0 : i32
    return %c0_i32, %c0_i32_0 : i32, i32
  }
  func.func @transform_1(%arg0: i32, %arg1: memref<1xi32, #tpu.memory_space<smem>>) -> (i32, i32, i32) {
    %c0_i32 = arith.constant 0 : i32
    %c0_i32_0 = arith.constant 0 : i32
    %c0_i32_1 = arith.constant 0 : i32
    return %arg0, %c0_i32, %c0_i32_0 : i32, i32, i32
  }
  func.func @transform_2(%arg0: i32, %arg1: memref<1xi32, #tpu.memory_space<smem>>) -> (i32, i32) {
    %c0_i32 = arith.constant 0 : i32
    %c0_i32_0 = arith.constant 0 : i32
    %c0_i32_1 = arith.constant 0 : i32
    return %c0_i32, %c0_i32_0 : i32, i32
  }
  func.func @transform_3(%arg0: i32, %arg1: memref<1xi32, #tpu.memory_space<smem>>) -> (i32, i32) {
    %c0_i32 = arith.constant 0 : i32
    %c0_i32_0 = arith.constant 0 : i32
    %c0_i32_1 = arith.constant 0 : i32
    return %c0_i32, %c0_i32_0 : i32, i32
  }
  func.func @transform_4(%arg0: i32, %arg1: memref<1xi32, #tpu.memory_space<smem>>) -> (i32, i32) {
    %c0_i32 = arith.constant 0 : i32
    %c0_i32_0 = arith.constant 0 : i32
    %c0_i32_1 = arith.constant 0 : i32
    return %c0_i32, %c0_i32_0 : i32, i32
  }
  func.func @transform_5(%arg0: i32, %arg1: memref<1xi32, #tpu.memory_space<smem>>) -> (i32, i32) {
    %c0_i32 = arith.constant 0 : i32
    %c0_i32_0 = arith.constant 0 : i32
    %c0_i32_1 = arith.constant 0 : i32
    return %c0_i32, %c0_i32_0 : i32, i32
  }
  func.func @transform_6(%arg0: i32, %arg1: memref<1xi32, #tpu.memory_space<smem>>) -> (i32, i32) {
    %c0_i32 = arith.constant 0 : i32
    %c0_i32_0 = arith.constant 0 : i32
    %c0_i32_1 = arith.constant 0 : i32
    return %c0_i32, %c0_i32_0 : i32, i32
  }
  func.func @transform_7(%arg0: i32, %arg1: memref<1xi32, #tpu.memory_space<smem>>) -> (i32, i32) {
    %c0_i32 = arith.constant 0 : i32
    %c0_i32_0 = arith.constant 0 : i32
    %c0_i32_1 = arith.constant 0 : i32
    return %c0_i32, %c0_i32_0 : i32, i32
  }
  func.func @transform_8(%arg0: i32, %arg1: memref<1xi32, #tpu.memory_space<smem>>) -> (i32, i32) {
    %c0_i32 = arith.constant 0 : i32
    %c0_i32_0 = arith.constant 0 : i32
    %c0_i32_1 = arith.constant 0 : i32
    return %c0_i32, %c0_i32_0 : i32, i32
  }
}

</mosaic_0001>

<bundles_post_ra>
// kernel: tpu_custom_call.1
= control target key start
LH: loop header
LB: loop body
LE: loop exit
PB: predicated region body
PF: predicated region fallthrough
CT: control target
= control target key end

     0   :  { %s3262_s0 = inlined_call_operand.<no memory space> [shape: s32[1], index: 0, kind: input, shape index: {}]   ;;  %s3263_s1 = inlined_call_operand.vmem [shape: s32[8,1], index: 1, kind: input, shape index: {}]   ;;  %s3264_s2 = inlined_call_operand.hbm [shape: bf16[1,64,128], index: 2, kind: input, shape index: {}]   ;;  %s3265_s3 = inlined_call_operand.vmem [shape: bf16[128,512], index: 3, kind: input, shape index: {}]   ;;  %s3266_s4 = inlined_call_operand.hbm [shape: bf16[128,512], index: 4, kind: input, shape index: {}]   ;;  %s3267_s5 = inlined_call_operand.vmem [shape: f32[128,64], index: 5, kind: input, shape index: {}]   ;;  %s3268_s6 = inlined_call_operand.vmem [shape: f32[1,64], index: 6, kind: input, shape index: {}]   ;;  %s3269_s7 = inlined_call_operand.vmem [shape: f32[64,1], index: 7, kind: input, shape index: {}]   ;;  %s3270_s8 = inlined_call_operand.<no memory space> [shape: f32[1,1], index: 8, kind: input, shape index: {}]   ;;  %s3271_s9 = inlined_call_operand.vmem [shape: f32[8,1], index: 9, kind: output, shape index: {}]  }
   0x1   :  { %v15_v0 = vstv %s3270_s8 }
   0x2   :  { %16 = vst [vmem:[#allocation7] sm:$0x1] %v15_v0 }
   0x3   :  { %17 = vsyncpa [#allocation9], 0 }
   0x4   :  { %18 = vsyncpa [#allocation11], 0  ;;  %s2450_s11 = smov [#allocation8]   ;;  %s2402_s15 = scalar_lea.hbm %s3264_s2, 512 }
   0x5   :  { %s26_s12 = sshll.u32 %s2450_s11, 4  ;;  %p2403_p0 = scmp.ne.s32.totalorder %s3264_s2, %s2402_s15  ;;  %s27_s12 = int_to_ptr.vmem [resolvable:$true] %s26_s12 }
   0x6   :  { %p2406_p1 = scmp.lt.u32.totalorder %s2402_s15, %s3264_s2 }
   0x8   :  { %p2408_p2 = pnand %p2406_p1, %p2403_p0 }
   0xa   :  { %2411 = shalt.err (!%p2408_p2)
}
   0xb   :  { %s2412_s8 = scalar_lea.vmem %s27_s12, 512  ;;  %p2417_p4 = scmp.lt.s32.totalorder %s27_s12, %s27_s12 }
   0xc   :  { %p2413_p3 = scmp.ne.s32.totalorder %s27_s12, %s2412_s8  ;;  %p2418_p5 = scmp.lt.s32.totalorder %s2412_s8, %s2412_s8 }
   0xe   :  { %p2419_p6 = por %p2418_p5, %p2417_p4 }
  0x10   :  { %p2420_p7 = pnand %p2419_p6, %p2413_p3 }
  0x12   :  { %2423 = shalt.err (!%p2420_p7)
}
  0x13   :  { %s2451_s20 = smov 64   ;;  %s2452_s21 = smov 4  }
  0x14   :  { %32 = dma.hbm_to_vmem [thread:$0]  %s3264_s2, 512, %s27_s12, [#allocation9], %s2451_s20, %s2451_s20, %s2452_s21  }
  0x15   :  { %s2453_s24 = smov [#allocation10]   ;;  %s2424_s28 = scalar_lea.hbm %s3266_s4, 4096 }
  0x16   :  { %s40_s25 = sshll.u32 %s2453_s24, 4  ;;  %p2425_p8 = scmp.ne.s32.totalorder %s3266_s4, %s2424_s28  ;;  %s41_s25 = int_to_ptr.vmem [resolvable:$true] %s40_s25 }
  0x17   :  { %p2428_p9 = scmp.lt.u32.totalorder %s2424_s28, %s3266_s4 }
  0x19   :  { %p2430_p10 = pnand %p2428_p9, %p2425_p8 }
  0x1b   :  { %2433 = shalt.err (!%p2430_p10)
}
  0x1c   :  { %s2434_s13 = scalar_lea.vmem %s41_s25, 4096  ;;  %p2439_p12 = scmp.lt.s32.totalorder %s41_s25, %s41_s25 }
  0x1d   :  { %p2435_p11 = scmp.ne.s32.totalorder %s41_s25, %s2434_s13  ;;  %p2440_p13 = scmp.lt.s32.totalorder %s2434_s13, %s2434_s13 }
  0x1f   :  { %p2441_p0 = por %p2440_p13, %p2439_p12 }
  0x21   :  { %p2442_p1 = pnand %p2441_p0, %p2435_p11 }
  0x23   :  { %2445 = shalt.err (!%p2442_p1)
}
  0x24   :  { %s2454_s2 = smov 256   ;;  %s2455_s12 = smov 16  }
  0x25   :  { %46 = dma.hbm_to_vmem [thread:$0]  %s3266_s4, 4096, %s41_s25, [#allocation11], %s2454_s2, %s2454_s2, %s2455_s12  }
  0x26   :  { %2446 = dma.done.wait [#allocation9], 512  }
  0x27   :  { %2447 = vsyncadd [#allocation9], 4294966784 }
  0x28   :  { %2448 = dma.done.wait [#allocation11], 4096  }
  0x29   :  { %2449 = vsyncadd [#allocation11], 4294963200  ;;  %v3272_v1 = vmov 0.0   ;;  %p1905_p2 = scmp.le.s32.totalorder %s3262_s0, 0 }
  0x2a   :  { %66 = vst [vmem:[#allocation2] sm:$0xff] %v3272_v1  ;;  %67 = vst [vmem:[#allocation3] sm:$0xff] %v3272_v1 }
  0x2b   :  { %73 = sbr.rel (%p1905_p2) target bundleno = 2204 (0x89c), region = 49 }
  0x32   :  { %v2138_v2 = vld [vmem:[%s3265_s3 + $0x4] ss:$16 sps:$4 sm:$0xff]   ;;  %v2140_v3 = vld [vmem:[%s3265_s3 + $0xc] ss:$16 sps:$4 sm:$0xff]   ;;  %v3274_v4 = vmov 0  }
  0x33   :  { %330 = vmatprep.mubr.bf16.mxu0 %v3274_v4  ;;  %403 = vmatprep.mubr.bf16.mxu1 %v3274_v4  ;;  %v2142_v5 = vld [vmem:[%s3265_s3] ss:$16 sps:$4 sm:$0xff]   ;;  %v2143_v6 = vld [vmem:[%s3265_s3 + $0x8] ss:$16 sps:$4 sm:$0xff]   ;;  %v2144_v7 = vld [vmem:[%s3265_s3 + $0x24] ss:$16 sps:$4 sm:$0xff]  }
  0x34   :  { %298 = vmatprep.subr.bf16.mxu0 %v2138_v2  ;;  %2136 = vset.pattern.permute.xlu0 %v3274_v4  ;;  %v2146_v8 = vld [vmem:[%s3265_s3 + $0x2c] ss:$16 sps:$4 sm:$0xff]   ;;  %v2148_v9 = vld [vmem:[%s3265_s3 + $0x20] ss:$16 sps:$4 sm:$0xff]   ;;  %v2149_v10 = vld [vmem:[%s3265_s3 + $0x28] ss:$16 sps:$4 sm:$0xff]  }
  0x35   :  { %371 = vmatprep.subr.bf16.mxu1 %v2140_v3  ;;  %2137 = vset.pattern.permute.xlu1 %v3274_v4  ;;  %v2150_v11 = vld [vmem:[%s3265_s3 + $0x44] ss:$16 sps:$4 sm:$0xff]   ;;  %v2152_v12 = vld [vmem:[%s3265_s3 + $0x4c] ss:$16 sps:$4 sm:$0xff]   ;;  %v2154_v13 = vld [vmem:[%s3265_s3 + $0x40] ss:$16 sps:$4 sm:$0xff]  }
  0x36   :  { %299 = vmatpush1.bf16.msra.mxu0 %v2142_v5  ;;  %372 = vmatpush1.bf16.msra.mxu1 %v2143_v6  ;;  %v2155_v14 = vld [vmem:[%s3265_s3 + $0x48] ss:$16 sps:$4 sm:$0xff]   ;;  %v2156_v15 = vld [vmem:[%s3265_s3 + $0x64] ss:$16 sps:$4 sm:$0xff]   ;;  %v2158_v16 = vld [vmem:[%s3265_s3 + $0x6c] ss:$16 sps:$4 sm:$0xff]  }
  0x37   :  { %300 = vmatprep.subr.bf16.mxu0 %v2144_v7  ;;  %373 = vmatprep.subr.bf16.mxu1 %v2146_v8  ;;  %v2160_v17 = vld [vmem:[%s3265_s3 + $0x60] ss:$16 sps:$4 sm:$0xff]   ;;  %v2161_v18 = vld [vmem:[%s3265_s3 + $0x68] ss:$16 sps:$4 sm:$0xff]   ;;  %v2162_v19 = vld [vmem:[%s3265_s3 + $0x84] ss:$16 sps:$4 sm:$0xff]  }
  0x38   :  { %v2164_v20 = vld [vmem:[%s3265_s3 + $0x8c] ss:$16 sps:$4 sm:$0xff]   ;;  %v2166_v21 = vld [vmem:[%s3265_s3 + $0x80] ss:$16 sps:$4 sm:$0xff]   ;;  %v2167_v22 = vld [vmem:[%s3265_s3 + $0x88] ss:$16 sps:$4 sm:$0xff]  }
  0x39   :  { %v2168_v23 = vld [vmem:[%s3265_s3 + $0xa4] ss:$16 sps:$4 sm:$0xff]   ;;  %v2170_v24 = vld [vmem:[%s3265_s3 + $0xac] ss:$16 sps:$4 sm:$0xff]   ;;  %v2172_v25 = vld [vmem:[%s3265_s3 + $0xa0] ss:$16 sps:$4 sm:$0xff]  }
  0x3a   :  { %301 = vmatpush1.bf16.msra.mxu0 %v2148_v9  ;;  %374 = vmatpush1.bf16.msra.mxu1 %v2149_v10  ;;  %v2173_v26 = vld [vmem:[%s3265_s3 + $0xa8] ss:$16 sps:$4 sm:$0xff]   ;;  %v2174_v27 = vld [vmem:[%s3265_s3 + $0xc4] ss:$16 sps:$4 sm:$0xff]   ;;  %v2176_v28 = vld [vmem:[%s3265_s3 + $0xcc] ss:$16 sps:$4 sm:$0xff]  }
  0x3b   :  { %302 = vmatprep.subr.bf16.mxu0 %v2150_v11  ;;  %375 = vmatprep.subr.bf16.mxu1 %v2152_v12  ;;  %v2178_v29 = vld [vmem:[%s3265_s3 + $0xc0] ss:$16 sps:$4 sm:$0xff]   ;;  %v2179_v30 = vld [vmem:[%s3265_s3 + $0xc8] ss:$16 sps:$4 sm:$0xff]   ;;  %v2180_v31 = vld [vmem:[%s3265_s3 + $0xe4] ss:$16 sps:$4 sm:$0xff]  }
  0x3c   :  { %v2182_v32 = vld [vmem:[%s3265_s3 + $0xec] ss:$16 sps:$4 sm:$0xff]   ;;  %v2184_v33 = vld [vmem:[%s3265_s3 + $0xe0] ss:$16 sps:$4 sm:$0xff]   ;;  %v2185_v34 = vld [vmem:[%s3265_s3 + $0xe8] ss:$16 sps:$4 sm:$0xff]  }
  0x3d   :  { %v2642_v35 = vld [vmem:[#allocation10 + $0x4] ss:$16 sps:$4 sm:$0xff]   ;;  %v2644_v36 = vld [vmem:[#allocation10 + $0xc] ss:$16 sps:$4 sm:$0xff]   ;;  %v2646_v38 = vld [vmem:[#allocation10] ss:$16 sps:$4 sm:$0xff]  }
  0x3e   :  { %303 = vmatpush1.bf16.msra.mxu0 %v2154_v13  ;;  %376 = vmatpush1.bf16.msra.mxu1 %v2155_v14  ;;  %v2186_v37 = vld [vmem:[#allocation8] sm:$0xff]   ;;  %v2648_v39 = vld [vmem:[#allocation10 + $0x8] ss:$16 sps:$4 sm:$0xff]   ;;  %v2654_v41 = vld [vmem:[#allocation10 + $0x2c] ss:$16 sps:$4 sm:$0xff]  }
  0x3f   :  { %304 = vmatprep.subr.bf16.mxu0 %v2156_v15  ;;  %377 = vmatprep.subr.bf16.mxu1 %v2158_v16  ;;  %v2652_v40 = vld [vmem:[#allocation10 + $0x24] ss:$16 sps:$4 sm:$0xff]   ;;  %v2656_v42 = vld [vmem:[#allocation10 + $0x20] ss:$16 sps:$4 sm:$0xff]   ;;  %v2660_v43 = vld [vmem:[#allocation10 + $0x28] ss:$16 sps:$4 sm:$0xff]  }
  0x40   :  { %v2664_v44 = vld [vmem:[#allocation10 + $0x44] ss:$16 sps:$4 sm:$0xff]   ;;  %v2666_v45 = vld [vmem:[#allocation10 + $0x4c] ss:$16 sps:$4 sm:$0xff]   ;;  %v2670_v47 = vld [vmem:[#allocation10 + $0x40] ss:$16 sps:$4 sm:$0xff]  }
  0x41   :  { %v2199_v46 = vld [vmem:[#allocation8 + $0x8] sm:$0xff]   ;;  %v2676_v49 = vld [vmem:[#allocation10 + $0x64] ss:$16 sps:$4 sm:$0xff]   ;;  %v2682_v51 = vld [vmem:[#allocation10 + $0x60] ss:$16 sps:$4 sm:$0xff]  }
  0x42   :  { %305 = vmatpush1.bf16.msra.mxu0 %v2160_v17  ;;  %378 = vmatpush1.bf16.msra.mxu1 %v2161_v18  ;;  %v2672_v48 = vld [vmem:[#allocation10 + $0x48] ss:$16 sps:$4 sm:$0xff]   ;;  %v2680_v50 = vld [vmem:[#allocation10 + $0x6c] ss:$16 sps:$4 sm:$0xff]   ;;  %v2688_v53 = vld [vmem:[#allocation10 + $0x84] ss:$16 sps:$4 sm:$0xff]  }
  0x43   :  { %306 = vmatprep.subr.bf16.mxu0 %v2162_v19  ;;  %379 = vmatprep.subr.bf16.mxu1 %v2164_v20  ;;  %v2684_v52 = vld [vmem:[#allocation10 + $0x68] ss:$16 sps:$4 sm:$0xff]   ;;  %v2692_v54 = vld [vmem:[#allocation10 + $0x8c] ss:$16 sps:$4 sm:$0xff]   ;;  %v2212_v55 = vld [vmem:[#allocation8 + $0x10] sm:$0xff]  }
  0x44   :  { %v2699_v56 = vld [vmem:[%s3263_s1] sm:$0xff]  ;;  %v2705_v58 = vld [vmem:[#allocation10 + $0x88] ss:$16 sps:$4 sm:$0xff]  }
  0x45   :  { %v2703_v57 = vld [vmem:[#allocation10 + $0x80] ss:$16 sps:$4 sm:$0xff]   ;;  %vm1977_vm0 = vcmp.gt.s32.totalorder %v2699_v56, 0  ;;  %v2710_v59 = vld [vmem:[#allocation10 + $0xa4] ss:$16 sps:$4 sm:$0xff]   ;;  %vm1981_vm1 = vcmp.gt.s32.totalorder %v2699_v56, 1 }
  0x46   :  { %307 = vmatpush1.bf16.msra.mxu0 %v2166_v21  ;;  %380 = vmatpush1.bf16.msra.mxu1 %v2167_v22  ;;  %v2712_v60 = vld [vmem:[#allocation10 + $0xac] ss:$16 sps:$4 sm:$0xff]   ;;  %v791_v61 = vsel %vm1977_vm0, 1, %v3274_v4  ;;  %v2718_v62 = vld [vmem:[#allocation10 + $0xa0] ss:$16 sps:$4 sm:$0xff]   ;;  %v919_v0 = vsel %vm1981_vm1, 1, %v3274_v4 }
  0x47   :  { %308 = vmatprep.subr.bf16.mxu0 %v2168_v23  ;;  %381 = vmatprep.subr.bf16.mxu1 %v2170_v24  ;;  %v2720_v63 = vld [vmem:[#allocation10 + $0xa8] ss:$16 sps:$4 sm:$0xff]   ;;  %v2725_v2 = vld [vmem:[#allocation10 + $0xc4] ss:$16 sps:$4 sm:$0xff]   ;;  %v2727_v3 = vld [vmem:[#allocation10 + $0xcc] ss:$16 sps:$4 sm:$0xff]  }
  0x48   :  { %793 = vperm.xlu0 %2136, %v791_v61   ;;  %v2225_v5 = vld [vmem:[#allocation8 + $0x18] sm:$0xff]   ;;  %v2733_v6 = vld [vmem:[#allocation10 + $0xc0] ss:$16 sps:$4 sm:$0xff]   ;;  %v2739_v8 = vld [vmem:[#allocation10 + $0xe4] ss:$16 sps:$4 sm:$0xff]   ;;  %vm1993_vm2 = vcmp.gt.s32.totalorder %v2699_v56, 4 }
  0x49   :  { %v2735_v7 = vld [vmem:[#allocation10 + $0xc8] ss:$16 sps:$4 sm:$0xff]   ;;  %v2741_v9 = vld [vmem:[#allocation10 + $0xec] ss:$16 sps:$4 sm:$0xff]   ;;  %v2746_v10 = vld [vmem:[#allocation10 + $0xe0] ss:$16 sps:$4 sm:$0xff]  }
  0x4a   :  { %309 = vmatpush1.bf16.msra.mxu0 %v2172_v25  ;;  %382 = vmatpush1.bf16.msra.mxu1 %v2173_v26  ;;  %v2748_v11 = vld [vmem:[#allocation10 + $0xe8] ss:$16 sps:$4 sm:$0xff]   ;;  %v2750_v12 = vld [vmem:[#allocation2] sm:$0xff]  ;;  %v1303_v13 = vsel %vm1993_vm2, 1, %v3274_v4  ;;  %vm2001_vm3 = vcmp.gt.s32.totalorder %v2699_v56, 6  ;;  %vm1985_vm5 = vcmp.gt.s32.totalorder %v2699_v56, 2 }
  0x4b   :  { %310 = vmatprep.subr.bf16.mxu0 %v2174_v27  ;;  %383 = vmatprep.subr.bf16.mxu1 %v2176_v28  ;;  %v486_v14 = vpack.c.bf16 %v2750_v12, %v2750_v12  ;;  %v1559_v15 = vsel %vm2001_vm3, 1, %v3274_v4  ;;  %vm1989_vm6 = vcmp.gt.s32.totalorder %v2699_v56, 3  ;;  %vm1997_vm7 = vcmp.gt.s32.totalorder %v2699_v56, 5 }
  0x4c   :  { %921 = vperm.xlu0 %2136, %v919_v0   ;;  %vm2005_vm8 = vcmp.gt.s32.totalorder %v2699_v56, 7 }
  0x4e   :  { %311 = vmatpush1.bf16.msra.mxu0 %v2178_v29  ;;  %384 = vmatpush1.bf16.msra.mxu1 %v2179_v30 }
  0x4f   :  { %312 = vmatprep.subr.bf16.mxu0 %v2180_v31  ;;  %385 = vmatprep.subr.bf16.mxu1 %v2182_v32 }
  0x50   :  { %1305 = vperm.xlu0 %2136, %v1303_v13  }
  0x52   :  { %313 = vmatpush1.bf16.msra.mxu0 %v2184_v33  ;;  %386 = vmatpush1.bf16.msra.mxu1 %v2185_v34 }
  0x53   :  { %679 = vmatprep.subr.bf16.mxu0 %v2642_v35  ;;  %720 = vmatprep.subr.bf16.mxu1 %v2644_v36 }
  0x54   :  { %1561 = vperm.xlu0 %2136, %v1559_v15  }
  0x55   :  { %331 = vmatmul.mubr.bf16.vlgmr.msra.gmra.mrb[0].mxu0 %v2186_v37  ;;  %404 = vmatmul.mubr.bf16.vlgmr.msra.gmra.mrb[0].mxu1 %v2186_v37 }
  0x56   :  { %680 = vmatpush1.bf16.msra.mxu0 %v2646_v38  ;;  %721 = vmatpush1.bf16.msra.mxu1 %v2648_v39 }
  0x57   :  { %681 = vmatprep.subr.bf16.mxu0 %v2652_v40  ;;  %722 = vmatprep.subr.bf16.mxu1 %v2654_v41 }
  0x58   :  { %340 = vmatprep.mubr.bf16.mxu0 %v3274_v4  ;;  %413 = vmatprep.mubr.bf16.mxu1 %v3274_v4 }
  0x5a   :  { %682 = vmatpush1.bf16.msra.mxu0 %v2656_v42  ;;  %723 = vmatpush1.bf16.msra.mxu1 %v2660_v43 }
  0x5b   :  { %683 = vmatprep.subr.bf16.mxu0 %v2664_v44  ;;  %724 = vmatprep.subr.bf16.mxu1 %v2666_v45 }
  0x5d   :  { %341 = vmatmul.mubr.bf16.gmra.mrb[4].mxu0 %v2199_v46  ;;  %414 = vmatmul.mubr.bf16.gmra.mrb[4].mxu1 %v2199_v46 }
  0x5e   :  { %684 = vmatpush1.bf16.msra.mxu0 %v2670_v47  ;;  %725 = vmatpush1.bf16.msra.mxu1 %v2672_v48 }
  0x5f   :  { %685 = vmatprep.subr.bf16.mxu0 %v2676_v49  ;;  %726 = vmatprep.subr.bf16.mxu1 %v2680_v50 }
  0x60   :  { %350 = vmatprep.mubr.bf16.mxu0 %v3274_v4  ;;  %423 = vmatprep.mubr.bf16.mxu1 %v3274_v4 }
  0x62   :  { %686 = vmatpush1.bf16.msra.mxu0 %v2682_v51  ;;  %727 = vmatpush1.bf16.msra.mxu1 %v2684_v52 }
  0x63   :  { %687 = vmatprep.subr.bf16.mxu0 %v2688_v53  ;;  %728 = vmatprep.subr.bf16.mxu1 %v2692_v54 }
  0x65   :  { %351 = vmatmul.mubr.bf16.gmra.mrb[8].mxu0 %v2212_v55  ;;  %424 = vmatmul.mubr.bf16.gmra.mrb[8].mxu1 %v2212_v55 }
  0x66   :  { %688 = vmatpush1.bf16.msra.mxu0 %v2703_v57  ;;  %729 = vmatpush1.bf16.msra.mxu1 %v2705_v58 }
  0x67   :  { %689 = vmatprep.subr.bf16.mxu0 %v2710_v59  ;;  %730 = vmatprep.subr.bf16.mxu1 %v2712_v60 }
  0x68   :  { %360 = vmatprep.mubr.bf16.mxu0 %v3274_v4  ;;  %433 = vmatprep.mubr.bf16.mxu1 %v3274_v4 }
  0x6a   :  { %690 = vmatpush1.bf16.msra.mxu0 %v2718_v62  ;;  %731 = vmatpush1.bf16.msra.mxu1 %v2720_v63 }
  0x6b   :  { %691 = vmatprep.subr.bf16.mxu0 %v2725_v2  ;;  %732 = vmatprep.subr.bf16.mxu1 %v2727_v3 }
  0x6d   :  { %361 = vmatmul.mubr.bf16.gmra.mrb[12].mxu0 %v2225_v5  ;;  %434 = vmatmul.mubr.bf16.gmra.mrb[12].mxu1 %v2225_v5 }
  0x6e   :  { %692 = vmatpush1.bf16.msra.mxu0 %v2733_v6  ;;  %733 = vmatpush1.bf16.msra.mxu1 %v2735_v7 }
  0x6f   :  { %693 = vmatprep.subr.bf16.mxu0 %v2739_v8  ;;  %734 = vmatprep.subr.bf16.mxu1 %v2741_v9 }
  0x70   :  { %711 = vmatprep.mubr.bf16.mxu0 %v3274_v4  ;;  %752 = vmatprep.mubr.bf16.mxu1 %v3274_v4 }
  0x72   :  { %694 = vmatpush1.bf16.msra.mxu0 %v2746_v10  ;;  %735 = vmatpush1.bf16.msra.mxu1 %v2748_v11 }
  0x73   :  { %807 = vmatprep.subr.bf16.mxu0 %v2642_v35  ;;  %848 = vmatprep.subr.bf16.mxu1 %v2644_v36 }
  0x75   :  { %712 = vmatmul.mubr.bf16.vlgmr.msra.gmra.mrb[16].mxu0 %v486_v14  ;;  %753 = vmatmul.mubr.bf16.vlgmr.msra.gmra.mrb[16].mxu1 %v486_v14 }
  0x76   :  { %808 = vmatpush1.bf16.msra.mxu0 %v2646_v38  ;;  %849 = vmatpush1.bf16.msra.mxu1 %v2648_v39 }
  0x77   :  { %809 = vmatprep.subr.bf16.mxu0 %v2652_v40  ;;  %850 = vmatprep.subr.bf16.mxu1 %v2654_v41 }
  0x78   :  { %839 = vmatprep.mubr.bf16.mxu0 %v3274_v4  ;;  %880 = vmatprep.mubr.bf16.mxu1 %v3274_v4 }
  0x7a   :  { %810 = vmatpush1.bf16.msra.mxu0 %v2656_v42  ;;  %851 = vmatpush1.bf16.msra.mxu1 %v2660_v43 }
  0x7b   :  { %811 = vmatprep.subr.bf16.mxu0 %v2664_v44  ;;  %852 = vmatprep.subr.bf16.mxu1 %v2666_v45 }
  0x7e   :  { %812 = vmatpush1.bf16.msra.mxu0 %v2670_v47  ;;  %853 = vmatpush1.bf16.msra.mxu1 %v2672_v48 }
  0x7f   :  { %813 = vmatprep.subr.bf16.mxu0 %v2676_v49  ;;  %854 = vmatprep.subr.bf16.mxu1 %v2680_v50 }
  0x82   :  { %814 = vmatpush1.bf16.msra.mxu0 %v2682_v51  ;;  %855 = vmatpush1.bf16.msra.mxu1 %v2684_v52 }
  0x83   :  { %815 = vmatprep.subr.bf16.mxu0 %v2688_v53  ;;  %856 = vmatprep.subr.bf16.mxu1 %v2692_v54 }
  0x86   :  { %816 = vmatpush1.bf16.msra.mxu0 %v2703_v57  ;;  %857 = vmatpush1.bf16.msra.mxu1 %v2705_v58 }
  0x87   :  { %817 = vmatprep.subr.bf16.mxu0 %v2710_v59  ;;  %858 = vmatprep.subr.bf16.mxu1 %v2712_v60 }
  0x8a   :  { %818 = vmatpush1.bf16.msra.mxu0 %v2718_v62  ;;  %859 = vmatpush1.bf16.msra.mxu1 %v2720_v63 }
  0x8b   :  { %819 = vmatprep.subr.bf16.mxu0 %v2725_v2  ;;  %860 = vmatprep.subr.bf16.mxu1 %v2727_v3 }
  0x8e   :  { %820 = vmatpush1.bf16.msra.mxu0 %v2733_v6  ;;  %861 = vmatpush1.bf16.msra.mxu1 %v2735_v7 }
  0x8f   :  { %821 = vmatprep.subr.bf16.mxu0 %v2739_v8  ;;  %862 = vmatprep.subr.bf16.mxu1 %v2741_v9 }
  0x92   :  { %822 = vmatpush1.bf16.msra.mxu0 %v2746_v10  ;;  %863 = vmatpush1.bf16.msra.mxu1 %v2748_v11 }
  0x93   :  { %935 = vmatprep.subr.bf16.mxu0 %v2642_v35  ;;  %976 = vmatprep.subr.bf16.mxu1 %v2644_v36 }
 0x128   :  { %v332_v16 = vpop.f32.mrb[0].mxu0  ;;  %v405_v17 = vpop.f32.mrb[0].mxu1 }
 0x129   :  { %v334_v18 = vpop.f32.mrb[1].mxu0  ;;  %v407_v19 = vpop.f32.mrb[1].mxu1 }
 0x12a   :  { %v2799_v20 = vpop.f32.mrb[2].mxu0  ;;  %v2801_v21 = vpop.f32.mrb[2].mxu1 }
 0x12b   :  { %v2803_v22 = vpop.f32.mrb[3].mxu0  ;;  %v2805_v23 = vpop.f32.mrb[3].mxu1 }
 0x130   :  { %v2807_v24 = vpop.f32.mrb[4].mxu0  ;;  %v2809_v25 = vpop.f32.mrb[4].mxu1 }
 0x131   :  { %v2811_v26 = vpop.f32.mrb[5].mxu0  ;;  %v2813_v27 = vpop.f32.mrb[5].mxu1 }
 0x132   :  { %v2815_v28 = vpop.f32.mrb[6].mxu0  ;;  %v2817_v29 = vpop.f32.mrb[6].mxu1 }
 0x133   :  { %3276 = vst [vmem:[#allocation14_spill] sm:$0xff] %v2815_v28  ;;  %3277 = vst [vmem:[#allocation15_spill] sm:$0xff] %v2817_v29  ;;  %v2819_v30 = vpop.f32.mrb[7].mxu0  ;;  %v2821_v31 = vpop.f32.mrb[7].mxu1 }
 0x134   :  { %3278 = vst [vmem:[#allocation16_spill] sm:$0xff] %v2819_v30  ;;  %3279 = vst [vmem:[#allocation17_spill] sm:$0xff] %v2821_v31 }
 0x138   :  { %v2823_v32 = vpop.f32.mrb[8].mxu0  ;;  %v2825_v33 = vpop.f32.mrb[8].mxu1 }
 0x139   :  { %3280 = vst [vmem:[#allocation18_spill] sm:$0xff] %v2823_v32  ;;  %3281 = vst [vmem:[#allocation19_spill] sm:$0xff] %v2825_v33  ;;  %v2827_v34 = vpop.f32.mrb[9].mxu0  ;;  %v2829_v37 = vpop.f32.mrb[9].mxu1 }
 0x13a   :  { %3282 = vst [vmem:[#allocation20_spill] sm:$0xff] %v2827_v34  ;;  %3283 = vst [vmem:[#allocation21_spill] sm:$0xff] %v2829_v37  ;;  %v2831_v46 = vpop.f32.mrb[10].mxu0  ;;  %v2833_v55 = vpop.f32.mrb[10].mxu1 }
 0x13b   :  { %3284 = vst [vmem:[#allocation22_spill] sm:$0xff] %v2831_v46  ;;  %3285 = vst [vmem:[#allocation23_spill] sm:$0xff] %v2833_v55  ;;  %v2835_v61 = vpop.f32.mrb[11].mxu0  ;;  %v2837_v0 = vpop.f32.mrb[11].mxu1 }
 0x13c   :  { %3286 = vst [vmem:[#allocation24_spill] sm:$0xff] %v2835_v61  ;;  %3287 = vst [vmem:[#allocation25_spill] sm:$0xff] %v2837_v0 }
 0x140   :  { %v2839_v5 = vpop.f32.mrb[12].mxu0  ;;  %v2841_v13 = vpop.f32.mrb[12].mxu1 }
 0x141   :  { %3288 = vst [vmem:[#allocation26_spill] sm:$0xff] %v2839_v5  ;;  %3289 = vst [vmem:[#allocation27_spill] sm:$0xff] %v2841_v13  ;;  %v2843_v14 = vpop.f32.mrb[13].mxu0  ;;  %v2845_v15 = vpop.f32.mrb[13].mxu1 }
 0x142   :  { %3290 = vst [vmem:[#allocation28_spill] sm:$0xff] %v2843_v14  ;;  %3291 = vst [vmem:[#allocation29_spill] sm:$0xff] %v2845_v15  ;;  %v2847_v1 = vpop.f32.mrb[14].mxu0  ;;  %v2849_v4 = vpop.f32.mrb[14].mxu1 }
 0x143   :  { %3292 = vst [vmem:[#allocation30_spill] sm:$0xff] %v2847_v1  ;;  %3293 = vst [vmem:[#allocation31_spill] sm:$0xff] %v2849_v4  ;;  %v2851_v37 = vpop.f32.mrb[15].mxu0  ;;  %v2853_v46 = vpop.f32.mrb[15].mxu1 }
 0x144   :  { %3294 = vst [vmem:[#allocation32_spill] sm:$0xff] %v2851_v37  ;;  %3295 = vst [vmem:[#allocation33_spill] sm:$0xff] %v2853_v46 }
 0x148   :  { %v713_v55 = vpop.f32.mrb[16].mxu0  ;;  %v754_v61 = vpop.f32.mrb[16].mxu1 }
 0x149   :  { %v761_v34 = vadd.f32 %v713_v55, %v332_v16  ;;  %v763_v0 = vadd.f32 %v754_v61, %v405_v17  ;;  %v715_v33 = vpop.f32.mrb[17].mxu0  ;;  %v756_v5 = vpop.f32.mrb[17].mxu1 }
 0x14a   :  { %v762_v32 = vadd.f32 %v715_v33, %v334_v18  ;;  %v764_v13 = vadd.f32 %v756_v5, %v407_v19  ;;  %v717_v31 = vpop.f32.mrb[18].mxu0  ;;  %v758_v14 = vpop.f32.mrb[18].mxu1  ;;  %v478_v19 = vld [vmem:[#allocation3] sm:$0xff] }
 0x14b   :  { %v1974_v30 = vmul.f32 -1.442695, %v761_v34  ;;  %v718_v15 = vpop.f32.mrb[19].mxu0  ;;  %v759_v29 = vpop.f32.mrb[19].mxu1 }
 0x14c   :  { %v1975_v1 = vmul.f32 -1.442695, %v762_v32  ;;  %v1976_v4 = vmul.f32 -1.442695, %v764_v13  ;;  %v794_v33 = vpop.permute.xlu0 %793 }
 0x14d   :  { %2238 = vpow2.f32 %v1974_v30  ;;  %vm795_vm4 = vcmp.eq.s32.totalorder %v794_v33, 1 }
 0x14e   :  { %2240 = vpow2.f32 %v1975_v1 }
 0x14f   :  { %2242 = vpow2.f32 %v1976_v4 }
 0x150   :  { %2244 = vtanh.f32 %v763_v0  ;;  %v3296_v0 = vmov 0  }
 0x151   :  { %v1175_v5 = vsel %vm1989_vm6, 1, %v3296_v0  ;;  %v1431_v13 = vsel %vm1997_vm7, 1, %v3296_v0  ;;  %v1687_v14 = vsel %vm2005_vm8, 1, %v3296_v0 }
 0x157   :  { %v2239_v37 = vpop.eup %2238 }
 0x158   :  { %v2241_v28 = vpop.eup %2240  ;;  %v768_v46 = vadd.f32 1.0, %v2239_v37 }
 0x159   :  { %v774_v16 = vadd.f32 1.0, %v2241_v28  ;;  %v2243_v17 = vpop.eup %2242 }
 0x15a   :  { %2246 = vrcp.f32 %v768_v46  ;;  %v2245_v18 = vpop.eup %2244  ;;  %v781_v55 = vadd.f32 1.0, %v2243_v17 }
 0x15b   :  { %2248 = vrcp.f32 %v774_v16 }
 0x15c   :  { %2250 = vrcp.f32 %v781_v55 }
 0x164   :  { %v2247_v31 = vpop.eup %2246 }
 0x165   :  { %v2249_v34 = vpop.eup %2248  ;;  %v785_v29 = vmul.f32 %v2247_v31, %v2245_v18 }
 0x166   :  { %v784_v32 = vmul.f32 %v2249_v34, %v478_v19  ;;  %v2251_v4 = vpop.eup %2250 }
 0x168   :  { %v786_v1 = vadd.f32 %v785_v29, %v784_v32 }
 0x16a   :  { %2252 = vtanh.f32 %v786_v1  ;;  %v2855_v30 = vsel %vm795_vm4, %v786_v1, %v478_v19 }
 0x174   :  { %v2253_v37 = vpop.eup %2252 }
 0x175   :  { %v788_v28 = vmul.f32 %v2253_v37, %v2251_v4 }
 0x177   :  { %v2858_v46 = vsel %vm795_vm4, %v788_v28, %v2750_v12  ;;  %v1047_v12 = vsel %vm1985_vm5, 1, %v3296_v0 }
 0x178   :  { %v806_v61 = vpack.c.bf16 %v2858_v46, %v2858_v46  ;;  %1049 = vperm.xlu1 %2137, %v1047_v12  }
 0x17a   :  { %840 = vmatmul.mubr.bf16.vlgmr.msra.gmra.mrb[20].mxu0 %v806_v61  ;;  %881 = vmatmul.mubr.bf16.vlgmr.msra.gmra.mrb[20].mxu1 %v806_v61 }
 0x17b   :  { %936 = vmatpush1.bf16.msra.mxu0 %v2646_v38  ;;  %977 = vmatpush1.bf16.msra.mxu1 %v2648_v39 }
 0x17c   :  { %937 = vmatprep.subr.bf16.mxu0 %v2652_v40  ;;  %978 = vmatprep.subr.bf16.mxu1 %v2654_v41 }
 0x17d   :  { %967 = vmatprep.mubr.bf16.mxu0 %v3296_v0  ;;  %1008 = vmatprep.mubr.bf16.mxu1 %v3296_v0 }
 0x17e   :  { %1177 = vperm.xlu1 %2137, %v1175_v5  }
 0x17f   :  { %938 = vmatpush1.bf16.msra.mxu0 %v2656_v42  ;;  %979 = vmatpush1.bf16.msra.mxu1 %v2660_v43 }
 0x180   :  { %939 = vmatprep.subr.bf16.mxu0 %v2664_v44  ;;  %980 = vmatprep.subr.bf16.mxu1 %v2666_v45 }
 0x182   :  { %1433 = vperm.xlu1 %2137, %v1431_v13  }
 0x183   :  { %940 = vmatpush1.bf16.msra.mxu0 %v2670_v47  ;;  %981 = vmatpush1.bf16.msra.mxu1 %v2672_v48 }
 0x184   :  { %941 = vmatprep.subr.bf16.mxu0 %v2676_v49  ;;  %982 = vmatprep.subr.bf16.mxu1 %v2680_v50 }
 0x186   :  { %1689 = vperm.xlu1 %2137, %v1687_v14  }
 0x187   :  { %942 = vmatpush1.bf16.msra.mxu0 %v2682_v51  ;;  %983 = vmatpush1.bf16.msra.mxu1 %v2684_v52 }
 0x188   :  { %943 = vmatprep.subr.bf16.mxu0 %v2688_v53  ;;  %984 = vmatprep.subr.bf16.mxu1 %v2692_v54 }
 0x18b   :  { %944 = vmatpush1.bf16.msra.mxu0 %v2703_v57  ;;  %985 = vmatpush1.bf16.msra.mxu1 %v2705_v58 }
 0x18c   :  { %945 = vmatprep.subr.bf16.mxu0 %v2710_v59  ;;  %986 = vmatprep.subr.bf16.mxu1 %v2712_v60 }
 0x18f   :  { %946 = vmatpush1.bf16.msra.mxu0 %v2718_v62  ;;  %987 = vmatpush1.bf16.msra.mxu1 %v2720_v63 }
 0x190   :  { %947 = vmatprep.subr.bf16.mxu0 %v2725_v2  ;;  %988 = vmatprep.subr.bf16.mxu1 %v2727_v3 }
 0x193   :  { %948 = vmatpush1.bf16.msra.mxu0 %v2733_v6  ;;  %989 = vmatpush1.bf16.msra.mxu1 %v2735_v7 }
 0x194   :  { %949 = vmatprep.subr.bf16.mxu0 %v2739_v8  ;;  %990 = vmatprep.subr.bf16.mxu1 %v2741_v9 }
 0x197   :  { %950 = vmatpush1.bf16.msra.mxu0 %v2746_v10  ;;  %991 = vmatpush1.bf16.msra.mxu1 %v2748_v11 }
 0x198   :  { %1063 = vmatprep.subr.bf16.mxu0 %v2642_v35  ;;  %1104 = vmatprep.subr.bf16.mxu1 %v2644_v36 }
 0x24d   :  { %v841_v15 = vpop.f32.mrb[20].mxu0  ;;  %v882_v16 = vpop.f32.mrb[20].mxu1 }
 0x24e   :  { %v889_v17 = vadd.f32 %v841_v15, %v2799_v20  ;;  %v891_v18 = vadd.f32 %v882_v16, %v2801_v21  ;;  %v843_v19 = vpop.f32.mrb[21].mxu0  ;;  %v884_v31 = vpop.f32.mrb[21].mxu1 }
 0x24f   :  { %v890_v33 = vadd.f32 %v843_v19, %v2803_v22  ;;  %v892_v34 = vadd.f32 %v884_v31, %v2805_v23  ;;  %v845_v55 = vpop.f32.mrb[22].mxu0  ;;  %v886_v29 = vpop.f32.mrb[22].mxu1 }
 0x250   :  { %v1978_v32 = vmul.f32 -1.442695, %v889_v17  ;;  %v846_v56 = vpop.f32.mrb[23].mxu0  ;;  %v887_v1 = vpop.f32.mrb[23].mxu1 }
 0x251   :  { %v1979_v4 = vmul.f32 -1.442695, %v890_v33  ;;  %v1980_v37 = vmul.f32 -1.442695, %v892_v34  ;;  %v922_v16 = vpop.permute.xlu0 %921 }
 0x252   :  { %2254 = vpow2.f32 %v1978_v32  ;;  %vm923_vm9 = vcmp.eq.s32.totalorder %v922_v16, 1 }
 0x253   :  { %2256 = vpow2.f32 %v1979_v4 }
 0x254   :  { %2258 = vpow2.f32 %v1980_v37 }
 0x255   :  { %2260 = vtanh.f32 %v891_v18 }
 0x25c   :  { %v2255_v28 = vpop.eup %2254 }
 0x25d   :  { %v2257_v61 = vpop.eup %2256  ;;  %v896_v20 = vadd.f32 1.0, %v2255_v28 }
 0x25e   :  { %v902_v21 = vadd.f32 1.0, %v2257_v61  ;;  %v2259_v22 = vpop.eup %2258 }
 0x25f   :  { %2262 = vrcp.f32 %v896_v20  ;;  %v2261_v12 = vpop.eup %2260  ;;  %v909_v14 = vadd.f32 1.0, %v2259_v22 }
 0x260   :  { %2264 = vrcp.f32 %v902_v21 }
 0x261   :  { %2266 = vrcp.f32 %v909_v14 }
 0x269   :  { %v2263_v23 = vpop.eup %2262 }
 0x26a   :  { %v2265_v5 = vpop.eup %2264  ;;  %v913_v13 = vmul.f32 %v2263_v23, %v2261_v12 }
 0x26b   :  { %v912_v15 = vmul.f32 %v2265_v5, %v2855_v30  ;;  %v2267_v18 = vpop.eup %2266 }
 0x26d   :  { %v914_v17 = vadd.f32 %v913_v13, %v912_v15  ;;  %v1050_v15 = vpop.permute.xlu1 %1049 }
 0x26e   :  { %vm1051_vm10 = vcmp.eq.s32.totalorder %v1050_v15, 1 }
 0x26f   :  { %2268 = vtanh.f32 %v914_v17  ;;  %v2910_v19 = vsel %vm923_vm9, %v914_v17, %v2855_v30 }
 0x279   :  { %v2269_v31 = vpop.eup %2268 }
 0x27a   :  { %v916_v33 = vmul.f32 %v2269_v31, %v2267_v18 }
 0x27c   :  { %v2913_v34 = vsel %vm923_vm9, %v916_v33, %v2858_v46 }
 0x27d   :  { %v934_v55 = vpack.c.bf16 %v2913_v34, %v2913_v34 }
 0x27f   :  { %968 = vmatmul.mubr.bf16.vlgmr.msra.gmra.mrb[24].mxu0 %v934_v55  ;;  %1009 = vmatmul.mubr.bf16.vlgmr.msra.gmra.mrb[24].mxu1 %v934_v55 }
 0x280   :  { %1064 = vmatpush1.bf16.msra.mxu0 %v2646_v38  ;;  %1105 = vmatpush1.bf16.msra.mxu1 %v2648_v39 }
 0x281   :  { %1065 = vmatprep.subr.bf16.mxu0 %v2652_v40  ;;  %1106 = vmatprep.subr.bf16.mxu1 %v2654_v41 }
 0x282   :  { %1095 = vmatprep.mubr.bf16.mxu0 %v3296_v0  ;;  %1136 = vmatprep.mubr.bf16.mxu1 %v3296_v0 }
 0x284   :  { %1066 = vmatpush1.bf16.msra.mxu0 %v2656_v42  ;;  %1107 = vmatpush1.bf16.msra.mxu1 %v2660_v43 }
 0x285   :  { %1067 = vmatprep.subr.bf16.mxu0 %v2664_v44  ;;  %1108 = vmatprep.subr.bf16.mxu1 %v2666_v45 }
 0x288   :  { %1068 = vmatpush1.bf16.msra.mxu0 %v2670_v47  ;;  %1109 = vmatpush1.bf16.msra.mxu1 %v2672_v48 }
 0x289   :  { %1069 = vmatprep.subr.bf16.mxu0 %v2676_v49  ;;  %1110 = vmatprep.subr.bf16.mxu1 %v2680_v50 }
 0x28c   :  { %1070 = vmatpush1.bf16.msra.mxu0 %v2682_v51  ;;  %1111 = vmatpush1.bf16.msra.mxu1 %v2684_v52 }
 0x28d   :  { %1071 = vmatprep.subr.bf16.mxu0 %v2688_v53  ;;  %1112 = vmatprep.subr.bf16.mxu1 %v2692_v54 }
 0x290   :  { %1072 = vmatpush1.bf16.msra.mxu0 %v2703_v57  ;;  %1113 = vmatpush1.bf16.msra.mxu1 %v2705_v58 }
 0x291   :  { %1073 = vmatprep.subr.bf16.mxu0 %v2710_v59  ;;  %1114 = vmatprep.subr.bf16.mxu1 %v2712_v60 }
 0x294   :  { %1074 = vmatpush1.bf16.msra.mxu0 %v2718_v62  ;;  %1115 = vmatpush1.bf16.msra.mxu1 %v2720_v63 }
 0x295   :  { %1075 = vmatprep.subr.bf16.mxu0 %v2725_v2  ;;  %1116 = vmatprep.subr.bf16.mxu1 %v2727_v3 }
 0x298   :  { %1076 = vmatpush1.bf16.msra.mxu0 %v2733_v6  ;;  %1117 = vmatpush1.bf16.msra.mxu1 %v2735_v7 }
 0x299   :  { %1077 = vmatprep.subr.bf16.mxu0 %v2739_v8  ;;  %1118 = vmatprep.subr.bf16.mxu1 %v2741_v9 }
 0x29c   :  { %1078 = vmatpush1.bf16.msra.mxu0 %v2746_v10  ;;  %1119 = vmatpush1.bf16.msra.mxu1 %v2748_v11 }
 0x29d   :  { %1191 = vmatprep.subr.bf16.mxu0 %v2642_v35  ;;  %1232 = vmatprep.subr.bf16.mxu1 %v2644_v36 }
 0x352   :  { %v969_v30 = vpop.f32.mrb[24].mxu0  ;;  %v1010_v46 = vpop.f32.mrb[24].mxu1 }
 0x353   :  { %v1017_v29 = vadd.f32 %v969_v30, %v2807_v24  ;;  %v1019_v32 = vadd.f32 %v1010_v46, %v2809_v25  ;;  %v971_v56 = vpop.f32.mrb[25].mxu0  ;;  %v1012_v1 = vpop.f32.mrb[25].mxu1 }
 0x354   :  { %v1018_v4 = vadd.f32 %v971_v56, %v2811_v26  ;;  %v1020_v37 = vadd.f32 %v1012_v1, %v2813_v27  ;;  %v973_v28 = vpop.f32.mrb[26].mxu0  ;;  %v1014_v61 = vpop.f32.mrb[26].mxu1  ;;  %v3297_v1 = vld [vmem:[#allocation14_spill] sm:$0xff] }
 0x355   :  { %v1982_v20 = vmul.f32 -1.442695, %v1017_v29  ;;  %v974_v21 = vpop.f32.mrb[27].mxu0  ;;  %v1015_v22 = vpop.f32.mrb[27].mxu1 }
 0x356   :  { %v1983_v12 = vmul.f32 -1.442695, %v1018_v4  ;;  %v1984_v23 = vmul.f32 -1.442695, %v1020_v37  ;;  %v3298_v37 = vld [vmem:[#allocation15_spill] sm:$0xff]  ;;  %v3299_v21 = vld [vmem:[#allocation16_spill] sm:$0xff] }
 0x357   :  { %2270 = vpow2.f32 %v1982_v20 }
 0x358   :  { %2272 = vpow2.f32 %v1983_v12  ;;  %v3300_v12 = vld [vmem:[#allocation17_spill] sm:$0xff] }
 0x359   :  { %2274 = vpow2.f32 %v1984_v23 }
 0x35a   :  { %2276 = vtanh.f32 %v1019_v32 }
 0x361   :  { %v2271_v5 = vpop.eup %2270 }
 0x362   :  { %v2273_v13 = vpop.eup %2272  ;;  %v1024_v24 = vadd.f32 1.0, %v2271_v5 }
 0x363   :  { %v1030_v25 = vadd.f32 1.0, %v2273_v13  ;;  %v2275_v26 = vpop.eup %2274 }
 0x364   :  { %2278 = vrcp.f32 %v1024_v24  ;;  %v2277_v14 = vpop.eup %2276  ;;  %v1037_v17 = vadd.f32 1.0, %v2275_v26 }
 0x365   :  { %2280 = vrcp.f32 %v1030_v25 }
 0x366   :  { %2282 = vrcp.f32 %v1037_v17 }
 0x36e   :  { %v2279_v27 = vpop.eup %2278 }
 0x36f   :  { %v2281_v16 = vpop.eup %2280  ;;  %v1041_v18 = vmul.f32 %v2279_v27, %v2277_v14 }
 0x370   :  { %v1040_v31 = vmul.f32 %v2281_v16, %v2910_v19  ;;  %v2283_v30 = vpop.eup %2282 }
 0x372   :  { %v1042_v33 = vadd.f32 %v1041_v18, %v1040_v31 }
 0x374   :  { %2284 = vtanh.f32 %v1042_v33  ;;  %v2957_v55 = vsel %vm1051_vm10, %v1042_v33, %v2910_v19 }
 0x37e   :  { %v2285_v46 = vpop.eup %2284 }
 0x37f   :  { %v1044_v29 = vmul.f32 %v2285_v46, %v2283_v30 }
 0x381   :  { %v2960_v32 = vsel %vm1051_vm10, %v1044_v29, %v2913_v34 }
 0x382   :  { %v1062_v56 = vpack.c.bf16 %v2960_v32, %v2960_v32 }
 0x384   :  { %1096 = vmatmul.mubr.bf16.vlgmr.msra.gmra.mrb[28].mxu0 %v1062_v56  ;;  %1137 = vmatmul.mubr.bf16.vlgmr.msra.gmra.mrb[28].mxu1 %v1062_v56  ;;  %v1178_v56 = vpop.permute.xlu1 %1177 }
 0x385   :  { %1192 = vmatpush1.bf16.msra.mxu0 %v2646_v38  ;;  %1233 = vmatpush1.bf16.msra.mxu1 %v2648_v39  ;;  %vm1179_vm11 = vcmp.eq.s32.totalorder %v1178_v56, 1  ;;  %v3079_v56 = vld [vmem:[#allocation10 + $0x28] ss:$16 sps:$4 sm:$0xff]  }
 0x386   :  { %1193 = vmatprep.subr.bf16.mxu0 %v2652_v40  ;;  %1234 = vmatprep.subr.bf16.mxu1 %v2654_v41 }
 0x387   :  { %1223 = vmatprep.mubr.bf16.mxu0 %v3296_v0  ;;  %1264 = vmatprep.mubr.bf16.mxu1 %v3296_v0 }
 0x389   :  { %1194 = vmatpush1.bf16.msra.mxu0 %v2656_v42  ;;  %1235 = vmatpush1.bf16.msra.mxu1 %v2660_v43 }
 0x38a   :  { %1195 = vmatprep.subr.bf16.mxu0 %v2664_v44  ;;  %1236 = vmatprep.subr.bf16.mxu1 %v2666_v45 }
 0x38d   :  { %1196 = vmatpush1.bf16.msra.mxu0 %v2670_v47  ;;  %1237 = vmatpush1.bf16.msra.mxu1 %v2672_v48 }
 0x38e   :  { %1197 = vmatprep.subr.bf16.mxu0 %v2676_v49  ;;  %1238 = vmatprep.subr.bf16.mxu1 %v2680_v50 }
 0x391   :  { %1198 = vmatpush1.bf16.msra.mxu0 %v2682_v51  ;;  %1239 = vmatpush1.bf16.msra.mxu1 %v2684_v52 }
 0x392   :  { %1199 = vmatprep.subr.bf16.mxu0 %v2688_v53  ;;  %1240 = vmatprep.subr.bf16.mxu1 %v2692_v54 }
 0x395   :  { %1200 = vmatpush1.bf16.msra.mxu0 %v2703_v57  ;;  %1241 = vmatpush1.bf16.msra.mxu1 %v2705_v58 }
 0x396   :  { %1201 = vmatprep.subr.bf16.mxu0 %v2710_v59  ;;  %1242 = vmatprep.subr.bf16.mxu1 %v2712_v60 }
 0x399   :  { %1202 = vmatpush1.bf16.msra.mxu0 %v2718_v62  ;;  %1243 = vmatpush1.bf16.msra.mxu1 %v2720_v63 }
 0x39a   :  { %1203 = vmatprep.subr.bf16.mxu0 %v2725_v2  ;;  %1244 = vmatprep.subr.bf16.mxu1 %v2727_v3 }
 0x39d   :  { %1204 = vmatpush1.bf16.msra.mxu0 %v2733_v6  ;;  %1245 = vmatpush1.bf16.msra.mxu1 %v2735_v7 }
 0x39e   :  { %1205 = vmatprep.subr.bf16.mxu0 %v2739_v8  ;;  %1246 = vmatprep.subr.bf16.mxu1 %v2741_v9 }
 0x3a1   :  { %1206 = vmatpush1.bf16.msra.mxu0 %v2746_v10  ;;  %1247 = vmatpush1.bf16.msra.mxu1 %v2748_v11 }
 0x3a2   :  { %1319 = vmatprep.subr.bf16.mxu0 %v2642_v35  ;;  %1360 = vmatprep.subr.bf16.mxu1 %v2644_v36 }
 0x457   :  { %v1097_v19 = vpop.f32.mrb[28].mxu0  ;;  %v1138_v34 = vpop.f32.mrb[28].mxu1 }
 0x458   :  { %v1145_v4 = vadd.f32 %v1097_v19, %v3297_v1  ;;  %v1147_v28 = vadd.f32 %v1138_v34, %v3298_v37  ;;  %v1099_v61 = vpop.f32.mrb[29].mxu0  ;;  %v1140_v20 = vpop.f32.mrb[29].mxu1 }
 0x459   :  { %v1146_v22 = vadd.f32 %v1099_v61, %v3299_v21  ;;  %v1148_v23 = vadd.f32 %v1140_v20, %v3300_v12  ;;  %v1101_v5 = vpop.f32.mrb[30].mxu0  ;;  %v1142_v13 = vpop.f32.mrb[30].mxu1 }
 0x45a   :  { %v1986_v24 = vmul.f32 -1.442695, %v1145_v4  ;;  %v1102_v25 = vpop.f32.mrb[31].mxu0  ;;  %v1143_v26 = vpop.f32.mrb[31].mxu1 }
 0x45b   :  { %v1987_v35 = vmul.f32 -1.442695, %v1146_v22  ;;  %v1988_v36 = vmul.f32 -1.442695, %v1148_v23 }
 0x45c   :  { %2286 = vpow2.f32 %v1986_v24 }
 0x45d   :  { %2288 = vpow2.f32 %v1987_v35  ;;  %v1306_v35 = vpop.permute.xlu0 %1305 }
 0x45e   :  { %2290 = vpow2.f32 %v1988_v36  ;;  %vm1307_vm12 = vcmp.eq.s32.totalorder %v1306_v35, 1 }
 0x45f   :  { %2292 = vtanh.f32 %v1147_v28 }
 0x466   :  { %v2287_v14 = vpop.eup %2286 }
 0x467   :  { %v2289_v27 = vpop.eup %2288  ;;  %v1152_v15 = vadd.f32 1.0, %v2287_v14 }
 0x468   :  { %v1158_v16 = vadd.f32 1.0, %v2289_v27  ;;  %v2291_v17 = vpop.eup %2290 }
 0x469   :  { %2294 = vrcp.f32 %v1152_v15  ;;  %v2293_v18 = vpop.eup %2292  ;;  %v1165_v46 = vadd.f32 1.0, %v2291_v17 }
 0x46a   :  { %2296 = vrcp.f32 %v1158_v16 }
 0x46b   :  { %2298 = vrcp.f32 %v1165_v46  ;;  %v3071_v46 = vld [vmem:[#allocation10 + $0x2c] ss:$16 sps:$4 sm:$0xff]  }
 0x473   :  { %v2295_v31 = vpop.eup %2294 }
 0x474   :  { %v2297_v33 = vpop.eup %2296  ;;  %v1169_v30 = vmul.f32 %v2295_v31, %v2293_v18  ;;  %v3062_v31 = vld [vmem:[#allocation10] ss:$16 sps:$4 sm:$0xff]  }
 0x475   :  { %v1168_v29 = vmul.f32 %v2297_v33, %v2957_v55  ;;  %v2299_v1 = vpop.eup %2298  ;;  %v3065_v33 = vld [vmem:[#allocation10 + $0x8] ss:$16 sps:$4 sm:$0xff]  }
 0x477   :  { %v1170_v19 = vadd.f32 %v1169_v30, %v1168_v29  ;;  %v3068_v30 = vld [vmem:[#allocation10 + $0x24] ss:$16 sps:$4 sm:$0xff]   ;;  %v3076_v29 = vld [vmem:[#allocation10 + $0x20] ss:$16 sps:$4 sm:$0xff]  }
 0x479   :  { %2300 = vtanh.f32 %v1170_v19  ;;  %v3004_v34 = vsel %vm1179_vm11, %v1170_v19, %v2957_v55  ;;  %v3082_v19 = vld [vmem:[#allocation10 + $0x44] ss:$16 sps:$4 sm:$0xff]  }
 0x483   :  { %v2301_v4 = vpop.eup %2300 }
 0x484   :  { %v1172_v37 = vmul.f32 %v2301_v4, %v2299_v1  ;;  %v3088_v1 = vld [vmem:[#allocation10 + $0x40] ss:$16 sps:$4 sm:$0xff]   ;;  %v3091_v4 = vld [vmem:[#allocation10 + $0x48] ss:$16 sps:$4 sm:$0xff]  }
 0x486   :  { %v3007_v28 = vsel %vm1179_vm11, %v1172_v37, %v2960_v32  ;;  %v3094_v37 = vld [vmem:[#allocation10 + $0x64] ss:$16 sps:$4 sm:$0xff]  }
 0x487   :  { %v1190_v61 = vpack.c.bf16 %v3007_v28, %v3007_v28 }
 0x489   :  { %1224 = vmatmul.mubr.bf16.vlgmr.msra.gmra.mrb[32].mxu0 %v1190_v61  ;;  %1265 = vmatmul.mubr.bf16.vlgmr.msra.gmra.mrb[32].mxu1 %v1190_v61  ;;  %v3100_v61 = vld [vmem:[#allocation10 + $0x60] ss:$16 sps:$4 sm:$0xff]  }
 0x48a   :  { %1320 = vmatpush1.bf16.msra.mxu0 %v2646_v38  ;;  %1361 = vmatpush1.bf16.msra.mxu1 %v2648_v39  ;;  %v3043_v38 = vld [vmem:[#allocation10 + $0x4] ss:$16 sps:$4 sm:$0xff]   ;;  %v3046_v39 = vld [vmem:[#allocation10 + $0xc] ss:$16 sps:$4 sm:$0xff]  }
 0x48b   :  { %1321 = vmatprep.subr.bf16.mxu0 %v2652_v40  ;;  %1362 = vmatprep.subr.bf16.mxu1 %v2654_v41 }
 0x48c   :  { %1351 = vmatprep.mubr.bf16.mxu0 %v3296_v0  ;;  %1392 = vmatprep.mubr.bf16.mxu1 %v3296_v0 }
 0x48e   :  { %1322 = vmatpush1.bf16.msra.mxu0 %v2656_v42  ;;  %1363 = vmatpush1.bf16.msra.mxu1 %v2660_v43  ;;  %v3301_v42 = vld [vmem:[#allocation18_spill] sm:$0xff] }
 0x48f   :  { %1323 = vmatprep.subr.bf16.mxu0 %v2664_v44  ;;  %1364 = vmatprep.subr.bf16.mxu1 %v2666_v45  ;;  %v3302_v44 = vld [vmem:[#allocation19_spill] sm:$0xff] }
 0x492   :  { %1324 = vmatpush1.bf16.msra.mxu0 %v2670_v47  ;;  %1365 = vmatpush1.bf16.msra.mxu1 %v2672_v48 }
 0x493   :  { %1325 = vmatprep.subr.bf16.mxu0 %v2676_v49  ;;  %1366 = vmatprep.subr.bf16.mxu1 %v2680_v50  ;;  %v3303_v49 = vld [vmem:[#allocation20_spill] sm:$0xff] }
 0x496   :  { %1326 = vmatpush1.bf16.msra.mxu0 %v2682_v51  ;;  %1367 = vmatpush1.bf16.msra.mxu1 %v2684_v52  ;;  %v3304_v51 = vld [vmem:[#allocation21_spill] sm:$0xff] }
 0x497   :  { %1327 = vmatprep.subr.bf16.mxu0 %v2688_v53  ;;  %1368 = vmatprep.subr.bf16.mxu1 %v2692_v54 }
 0x49a   :  { %1328 = vmatpush1.bf16.msra.mxu0 %v2703_v57  ;;  %1369 = vmatpush1.bf16.msra.mxu1 %v2705_v58 }
 0x49b   :  { %1329 = vmatprep.subr.bf16.mxu0 %v2710_v59  ;;  %1370 = vmatprep.subr.bf16.mxu1 %v2712_v60 }
 0x49e   :  { %1330 = vmatpush1.bf16.msra.mxu0 %v2718_v62  ;;  %1371 = vmatpush1.bf16.msra.mxu1 %v2720_v63 }
 0x49f   :  { %1331 = vmatprep.subr.bf16.mxu0 %v2725_v2  ;;  %1372 = vmatprep.subr.bf16.mxu1 %v2727_v3 }
 0x4a2   :  { %1332 = vmatpush1.bf16.msra.mxu0 %v2733_v6  ;;  %1373 = vmatpush1.bf16.msra.mxu1 %v2735_v7 }
 0x4a3   :  { %1333 = vmatprep.subr.bf16.mxu0 %v2739_v8  ;;  %1374 = vmatprep.subr.bf16.mxu1 %v2741_v9 }
 0x4a6   :  { %1334 = vmatpush1.bf16.msra.mxu0 %v2746_v10  ;;  %1375 = vmatpush1.bf16.msra.mxu1 %v2748_v11 }
 0x4a7   :  { %1447 = vmatprep.subr.bf16.mxu0 %v3043_v38  ;;  %1488 = vmatprep.subr.bf16.mxu1 %v3046_v39 }
 0x55c   :  { %v1225_v40 = vpop.f32.mrb[32].mxu0  ;;  %v1266_v41 = vpop.f32.mrb[32].mxu1 }
 0x55d   :  { %v1273_v43 = vadd.f32 %v1225_v40, %v3301_v42  ;;  %v1275_v45 = vadd.f32 %v1266_v41, %v3302_v44  ;;  %v1227_v47 = vpop.f32.mrb[33].mxu0  ;;  %v1268_v48 = vpop.f32.mrb[33].mxu1  ;;  %v3103_v40 = vld [vmem:[#allocation10 + $0x68] ss:$16 sps:$4 sm:$0xff]   ;;  %v3106_v41 = vld [vmem:[#allocation10 + $0x84] ss:$16 sps:$4 sm:$0xff]  }
 0x55e   :  { %v1274_v50 = vadd.f32 %v1227_v47, %v3303_v49  ;;  %v1276_v52 = vadd.f32 %v1268_v48, %v3304_v51  ;;  %v1229_v53 = vpop.f32.mrb[34].mxu0  ;;  %v1270_v54 = vpop.f32.mrb[34].mxu1  ;;  %v3109_v42 = vld [vmem:[#allocation10 + $0x8c] ss:$16 sps:$4 sm:$0xff]   ;;  %v3115_v44 = vld [vmem:[#allocation10 + $0x88] ss:$16 sps:$4 sm:$0xff]  }
 0x55f   :  { %v1990_v57 = vmul.f32 -1.442695, %v1273_v43  ;;  %v1230_v58 = vpop.f32.mrb[35].mxu0  ;;  %v1271_v59 = vpop.f32.mrb[35].mxu1  ;;  %v3112_v43 = vld [vmem:[#allocation10 + $0x80] ss:$16 sps:$4 sm:$0xff]  }
 0x560   :  { %v1991_v60 = vmul.f32 -1.442695, %v1274_v50  ;;  %v1992_v55 = vmul.f32 -1.442695, %v1276_v52  ;;  %v3121_v47 = vld [vmem:[#allocation10 + $0xac] ss:$16 sps:$4 sm:$0xff]  }
 0x561   :  { %2302 = vpow2.f32 %v1990_v57  ;;  %v3306_v48 = vld [vmem:[#allocation23_spill] sm:$0xff]  ;;  %v3307_v50 = vld [vmem:[#allocation24_spill] sm:$0xff]  ;;  %v3308_v51 = vld [vmem:[#allocation25_spill] sm:$0xff] }
 0x562   :  { %2304 = vpow2.f32 %v1991_v60 }
 0x563   :  { %2306 = vpow2.f32 %v1992_v55 }
 0x564   :  { %2308 = vtanh.f32 %v1275_v45  ;;  %v3118_v45 = vld [vmem:[#allocation10 + $0xa4] ss:$16 sps:$4 sm:$0xff]  }
 0x56b   :  { %v2303_v32 = vpop.eup %2302 }
 0x56c   :  { %v2305_v20 = vpop.eup %2304  ;;  %v1280_v21 = vadd.f32 1.0, %v2303_v32 }
 0x56d   :  { %v1286_v22 = vadd.f32 1.0, %v2305_v20  ;;  %v2307_v12 = vpop.eup %2306 }
 0x56e   :  { %2310 = vrcp.f32 %v1280_v21  ;;  %v2309_v23 = vpop.eup %2308  ;;  %v1293_v25 = vadd.f32 1.0, %v2307_v12 }
 0x56f   :  { %2312 = vrcp.f32 %v1286_v22 }
 0x570   :  { %2314 = vrcp.f32 %v1293_v25 }
 0x578   :  { %v2311_v5 = vpop.eup %2310 }
 0x579   :  { %v2313_v13 = vpop.eup %2312  ;;  %v1297_v24 = vmul.f32 %v2311_v5, %v2309_v23  ;;  %v1434_v5 = vpop.permute.xlu1 %1433 }
 0x57a   :  { %v1296_v26 = vmul.f32 %v2313_v13, %v3004_v34  ;;  %v2315_v27 = vpop.eup %2314  ;;  %vm1435_vm13 = vcmp.eq.s32.totalorder %v1434_v5, 1  ;;  %v3315_v5 = vld [vmem:[#allocation32_spill] sm:$0xff] }
 0x57c   :  { %v1298_v36 = vadd.f32 %v1297_v24, %v1296_v26 }
 0x57e   :  { %2316 = vtanh.f32 %v1298_v36  ;;  %v3055_v14 = vsel %vm1307_vm12, %v1298_v36, %v3004_v34  ;;  %v3085_v34 = vld [vmem:[#allocation10 + $0x4c] ss:$16 sps:$4 sm:$0xff]  }
 0x588   :  { %v2317_v15 = vpop.eup %2316 }
 0x589   :  { %v1300_v16 = vmul.f32 %v2317_v15, %v2315_v27  ;;  %v2390_v15 = vld [vmem:[#allocation10 + $0xc4] ss:$16 sps:$4 sm:$0xff]  }
 0x58b   :  { %v3058_v17 = vsel %vm1307_vm12, %v1300_v16, %v3007_v28  ;;  %v3097_v28 = vld [vmem:[#allocation10 + $0x6c] ss:$16 sps:$4 sm:$0xff]  }
 0x58c   :  { %v1318_v18 = vpack.c.bf16 %v3058_v17, %v3058_v17  ;;  %v2391_v16 = vld [vmem:[#allocation10 + $0xcc] ss:$16 sps:$4 sm:$0xff]  }
 0x58e   :  { %1352 = vmatmul.mubr.bf16.vlgmr.msra.gmra.mrb[36].mxu0 %v1318_v18  ;;  %1393 = vmatmul.mubr.bf16.vlgmr.msra.gmra.mrb[36].mxu1 %v1318_v18  ;;  %v2393_v18 = vld [vmem:[#allocation10 + $0xc8] ss:$16 sps:$4 sm:$0xff]  }
 0x58f   :  { %1448 = vmatpush1.bf16.msra.mxu0 %v3062_v31  ;;  %1489 = vmatpush1.bf16.msra.mxu1 %v3065_v33 }
 0x590   :  { %1449 = vmatprep.subr.bf16.mxu0 %v3068_v30  ;;  %1490 = vmatprep.subr.bf16.mxu1 %v3071_v46 }
 0x591   :  { %1479 = vmatprep.mubr.bf16.mxu0 %v3296_v0  ;;  %1520 = vmatprep.mubr.bf16.mxu1 %v3296_v0 }
 0x593   :  { %1450 = vmatpush1.bf16.msra.mxu0 %v3076_v29  ;;  %1491 = vmatpush1.bf16.msra.mxu1 %v3079_v56 }
 0x594   :  { %1451 = vmatprep.subr.bf16.mxu0 %v3082_v19  ;;  %1492 = vmatprep.subr.bf16.mxu1 %v3085_v34 }
 0x597   :  { %1452 = vmatpush1.bf16.msra.mxu0 %v3088_v1  ;;  %1493 = vmatpush1.bf16.msra.mxu1 %v3091_v4 }
 0x598   :  { %1453 = vmatprep.subr.bf16.mxu0 %v3094_v37  ;;  %1494 = vmatprep.subr.bf16.mxu1 %v3097_v28 }
 0x59b   :  { %1454 = vmatpush1.bf16.msra.mxu0 %v3100_v61  ;;  %1495 = vmatpush1.bf16.msra.mxu1 %v3103_v40 }
 0x59c   :  { %1455 = vmatprep.subr.bf16.mxu0 %v3106_v41  ;;  %1496 = vmatprep.subr.bf16.mxu1 %v3109_v42 }
 0x59f   :  { %1456 = vmatpush1.bf16.msra.mxu0 %v3112_v43  ;;  %1497 = vmatpush1.bf16.msra.mxu1 %v3115_v44 }
 0x5a0   :  { %1457 = vmatprep.subr.bf16.mxu0 %v3118_v45  ;;  %1498 = vmatprep.subr.bf16.mxu1 %v3121_v47 }
 0x5a3   :  { %1458 = vmatpush1.bf16.msra.mxu0 %v2718_v62  ;;  %1499 = vmatpush1.bf16.msra.mxu1 %v2720_v63 }
 0x5a4   :  { %1459 = vmatprep.subr.bf16.mxu0 %v2725_v2  ;;  %1500 = vmatprep.subr.bf16.mxu1 %v2727_v3  ;;  %v3305_v2 = vld [vmem:[#allocation22_spill] sm:$0xff] }
 0x5a7   :  { %1460 = vmatpush1.bf16.msra.mxu0 %v2733_v6  ;;  %1501 = vmatpush1.bf16.msra.mxu1 %v2735_v7 }
 0x5a8   :  { %1461 = vmatprep.subr.bf16.mxu0 %v2739_v8  ;;  %1502 = vmatprep.subr.bf16.mxu1 %v2741_v9 }
 0x5ab   :  { %1462 = vmatpush1.bf16.msra.mxu0 %v2746_v10  ;;  %1503 = vmatpush1.bf16.msra.mxu1 %v2748_v11 }
 0x5ac   :  { %1575 = vmatprep.subr.bf16.mxu0 %v3043_v38  ;;  %1616 = vmatprep.subr.bf16.mxu1 %v3046_v39 }
 0x661   :  { %v1353_v62 = vpop.f32.mrb[36].mxu0  ;;  %v1394_v63 = vpop.f32.mrb[36].mxu1 }
 0x662   :  { %v1401_v3 = vadd.f32 %v1353_v62, %v3305_v2  ;;  %v1403_v6 = vadd.f32 %v1394_v63, %v3306_v48  ;;  %v1355_v49 = vpop.f32.mrb[37].mxu0  ;;  %v1396_v7 = vpop.f32.mrb[37].mxu1 }
 0x663   :  { %v1402_v8 = vadd.f32 %v1355_v49, %v3307_v50  ;;  %v1404_v9 = vadd.f32 %v1396_v7, %v3308_v51  ;;  %v1357_v52 = vpop.f32.mrb[38].mxu0  ;;  %v1398_v10 = vpop.f32.mrb[38].mxu1 }
 0x664   :  { %v1994_v53 = vmul.f32 -1.442695, %v1401_v3  ;;  %v1358_v11 = vpop.f32.mrb[39].mxu0  ;;  %v1399_v54 = vpop.f32.mrb[39].mxu1 }
 0x665   :  { %v1995_v38 = vmul.f32 -1.442695, %v1402_v8  ;;  %v1996_v39 = vmul.f32 -1.442695, %v1404_v9  ;;  %v1562_v10 = vpop.permute.xlu0 %1561 }
 0x666   :  { %2318 = vpow2.f32 %v1994_v53  ;;  %vm1563_vm14 = vcmp.eq.s32.totalorder %v1562_v10, 1 }
 0x667   :  { %2320 = vpow2.f32 %v1995_v38 }
 0x668   :  { %2322 = vpow2.f32 %v1996_v39 }
 0x669   :  { %2324 = vtanh.f32 %v1403_v6 }
 0x670   :  { %v2319_v57 = vpop.eup %2318 }
 0x671   :  { %v2321_v58 = vpop.eup %2320  ;;  %v1408_v59 = vadd.f32 1.0, %v2319_v57 }
 0x672   :  { %v1414_v60 = vadd.f32 1.0, %v2321_v58  ;;  %v2323_v55 = vpop.eup %2322 }
 0x673   :  { %2326 = vrcp.f32 %v1408_v59  ;;  %v2325_v32 = vpop.eup %2324  ;;  %v1421_v12 = vadd.f32 1.0, %v2323_v55 }
 0x674   :  { %2328 = vrcp.f32 %v1414_v60 }
 0x675   :  { %2330 = vrcp.f32 %v1421_v12 }
 0x67d   :  { %v2327_v20 = vpop.eup %2326 }
 0x67e   :  { %v2329_v21 = vpop.eup %2328  ;;  %v1425_v22 = vmul.f32 %v2327_v20, %v2325_v32  ;;  %v3313_v32 = vld [vmem:[#allocation30_spill] sm:$0xff] }
 0x67f   :  { %v1424_v23 = vmul.f32 %v2329_v21, %v3055_v14  ;;  %v2331_v25 = vpop.eup %2330  ;;  %v3314_v21 = vld [vmem:[#allocation31_spill] sm:$0xff] }
 0x681   :  { %v1426_v13 = vadd.f32 %v1425_v22, %v1424_v23 }
 0x683   :  { %2332 = vtanh.f32 %v1426_v13  ;;  %v3142_v24 = vsel %vm1435_vm13, %v1426_v13, %v3055_v14  ;;  %v2389_v14 = vld [vmem:[#allocation10 + $0xa8] ss:$16 sps:$4 sm:$0xff]  }
 0x68d   :  { %v2333_v26 = vpop.eup %2332 }
 0x68e   :  { %v1428_v35 = vmul.f32 %v2333_v26, %v2331_v25  ;;  %v3316_v25 = vld [vmem:[#allocation33_spill] sm:$0xff] }
 0x690   :  { %v3145_v36 = vsel %vm1435_vm13, %v1428_v35, %v3058_v17  ;;  %v2392_v17 = vld [vmem:[#allocation10 + $0xc0] ss:$16 sps:$4 sm:$0xff]  }
 0x691   :  { %v1446_v27 = vpack.c.bf16 %v3145_v36, %v3145_v36 }
 0x693   :  { %1480 = vmatmul.mubr.bf16.vlgmr.msra.gmra.mrb[40].mxu0 %v1446_v27  ;;  %1521 = vmatmul.mubr.bf16.vlgmr.msra.gmra.mrb[40].mxu1 %v1446_v27 }
 0x694   :  { %1576 = vmatpush1.bf16.msra.mxu0 %v3062_v31  ;;  %1617 = vmatpush1.bf16.msra.mxu1 %v3065_v33  ;;  %v2394_v31 = vld [vmem:[#allocation10 + $0xe4] ss:$16 sps:$4 sm:$0xff]   ;;  %v2395_v33 = vld [vmem:[#allocation10 + $0xec] ss:$16 sps:$4 sm:$0xff]  }
 0x695   :  { %1577 = vmatprep.subr.bf16.mxu0 %v3068_v30  ;;  %1618 = vmatprep.subr.bf16.mxu1 %v3071_v46  ;;  %v2396_v30 = vld [vmem:[#allocation10 + $0xe0] ss:$16 sps:$4 sm:$0xff]   ;;  %v2397_v46 = vld [vmem:[#allocation10 + $0xe8] ss:$16 sps:$4 sm:$0xff]  }
 0x696   :  { %1607 = vmatprep.mubr.bf16.mxu0 %v3296_v0  ;;  %1648 = vmatprep.mubr.bf16.mxu1 %v3296_v0  ;;  %v2388_v0 = vld [vmem:[#allocation10 + $0xa0] ss:$16 sps:$4 sm:$0xff]  }
 0x698   :  { %1578 = vmatpush1.bf16.msra.mxu0 %v3076_v29  ;;  %1619 = vmatpush1.bf16.msra.mxu1 %v3079_v56 }
 0x699   :  { %1579 = vmatprep.subr.bf16.mxu0 %v3082_v19  ;;  %1620 = vmatprep.subr.bf16.mxu1 %v3085_v34  ;;  %v3309_v19 = vld [vmem:[#allocation26_spill] sm:$0xff] }
 0x69c   :  { %1580 = vmatpush1.bf16.msra.mxu0 %v3088_v1  ;;  %1621 = vmatpush1.bf16.msra.mxu1 %v3091_v4  ;;  %v3310_v1 = vld [vmem:[#allocation27_spill] sm:$0xff] }
 0x69d   :  { %1581 = vmatprep.subr.bf16.mxu0 %v3094_v37  ;;  %1622 = vmatprep.subr.bf16.mxu1 %v3097_v28 }
 0x6a0   :  { %1582 = vmatpush1.bf16.msra.mxu0 %v3100_v61  ;;  %1623 = vmatpush1.bf16.msra.mxu1 %v3103_v40  ;;  %v3311_v61 = vld [vmem:[#allocation28_spill] sm:$0xff] }
 0x6a1   :  { %1583 = vmatprep.subr.bf16.mxu0 %v3106_v41  ;;  %1624 = vmatprep.subr.bf16.mxu1 %v3109_v42  ;;  %v3312_v41 = vld [vmem:[#allocation29_spill] sm:$0xff] }
 0x6a4   :  { %1584 = vmatpush1.bf16.msra.mxu0 %v3112_v43  ;;  %1625 = vmatpush1.bf16.msra.mxu1 %v3115_v44 }
 0x6a5   :  { %1585 = vmatprep.subr.bf16.mxu0 %v3118_v45  ;;  %1626 = vmatprep.subr.bf16.mxu1 %v3121_v47 }
 0x6a8   :  { %1586 = vmatpush1.bf16.msra.mxu0 %v2388_v0  ;;  %1627 = vmatpush1.bf16.msra.mxu1 %v2389_v14 }
 0x6a9   :  { %1587 = vmatprep.subr.bf16.mxu0 %v2390_v15  ;;  %1628 = vmatprep.subr.bf16.mxu1 %v2391_v16 }
 0x6ac   :  { %1588 = vmatpush1.bf16.msra.mxu0 %v2392_v17  ;;  %1629 = vmatpush1.bf16.msra.mxu1 %v2393_v18 }
 0x6ad   :  { %1589 = vmatprep.subr.bf16.mxu0 %v2394_v31  ;;  %1630 = vmatprep.subr.bf16.mxu1 %v2395_v33 }
 0x6b0   :  { %1590 = vmatpush1.bf16.msra.mxu0 %v2396_v30  ;;  %1631 = vmatpush1.bf16.msra.mxu1 %v2397_v46 }
 0x766   :  { %v1481_v29 = vpop.f32.mrb[40].mxu0  ;;  %v1522_v56 = vpop.f32.mrb[40].mxu1 }
 0x767   :  { %v1529_v34 = vadd.f32 %v1481_v29, %v3309_v19  ;;  %v1531_v4 = vadd.f32 %v1522_v56, %v3310_v1  ;;  %v1483_v37 = vpop.f32.mrb[41].mxu0  ;;  %v1524_v28 = vpop.f32.mrb[41].mxu1 }
 0x768   :  { %v1530_v40 = vadd.f32 %v1483_v37, %v3311_v61  ;;  %v1532_v42 = vadd.f32 %v1524_v28, %v3312_v41  ;;  %v1485_v43 = vpop.f32.mrb[42].mxu0  ;;  %v1526_v44 = vpop.f32.mrb[42].mxu1 }
 0x769   :  { %v1998_v45 = vmul.f32 -1.442695, %v1529_v34  ;;  %v1486_v47 = vpop.f32.mrb[43].mxu0  ;;  %v1527_v62 = vpop.f32.mrb[43].mxu1 }
 0x76a   :  { %v1999_v63 = vmul.f32 -1.442695, %v1530_v40  ;;  %v2000_v2 = vmul.f32 -1.442695, %v1532_v42  ;;  %v1690_v34 = vpop.permute.xlu1 %1689 }
 0x76b   :  { %2334 = vpow2.f32 %v1998_v45  ;;  %vm1691_vm15 = vcmp.eq.s32.totalorder %v1690_v34, 1 }
 0x76c   :  { %2336 = vpow2.f32 %v1999_v63 }
 0x76d   :  { %2338 = vpow2.f32 %v2000_v2 }
 0x76e   :  { %2340 = vtanh.f32 %v1531_v4 }
 0x775   :  { %v2335_v3 = vpop.eup %2334 }
 0x776   :  { %v2337_v48 = vpop.eup %2336  ;;  %v1536_v6 = vadd.f32 1.0, %v2335_v3 }
 0x777   :  { %v1542_v49 = vadd.f32 1.0, %v2337_v48  ;;  %v2339_v7 = vpop.eup %2338 }
 0x778   :  { %2342 = vrcp.f32 %v1536_v6  ;;  %v2341_v50 = vpop.eup %2340  ;;  %v1549_v52 = vadd.f32 1.0, %v2339_v7 }
 0x779   :  { %2344 = vrcp.f32 %v1542_v49 }
 0x77a   :  { %2346 = vrcp.f32 %v1549_v52 }
 0x782   :  { %v2343_v8 = vpop.eup %2342 }
 0x783   :  { %v2345_v51 = vpop.eup %2344  ;;  %v1553_v9 = vmul.f32 %v2343_v8, %v2341_v50 }
 0x784   :  { %v1552_v53 = vmul.f32 %v2345_v51, %v3142_v24  ;;  %v2347_v38 = vpop.eup %2346 }
 0x786   :  { %v1554_v11 = vadd.f32 %v1553_v9, %v1552_v53 }
 0x788   :  { %2348 = vtanh.f32 %v1554_v11  ;;  %v1565_v54 = vsel %vm1563_vm14, %v1554_v11, %v3142_v24 }
 0x792   :  { %v2349_v39 = vpop.eup %2348 }
 0x793   :  { %v1556_v57 = vmul.f32 %v2349_v39, %v2347_v38 }
 0x795   :  { %v1564_v58 = vsel %vm1563_vm14, %v1556_v57, %v3145_v36 }
 0x796   :  { %v1574_v59 = vpack.c.bf16 %v1564_v58, %v1564_v58 }
 0x798   :  { %1608 = vmatmul.mubr.bf16.vlgmr.msra.gmra.mrb[44].mxu0 %v1574_v59  ;;  %1649 = vmatmul.mubr.bf16.vlgmr.msra.gmra.mrb[44].mxu1 %v1574_v59 }
 0x86b   :  { %v1609_v60 = vpop.f32.mrb[44].mxu0  ;;  %v1650_v55 = vpop.f32.mrb[44].mxu1 }
 0x86c   :  { %v1657_v20 = vadd.f32 %v1609_v60, %v3313_v32  ;;  %v1659_v22 = vadd.f32 %v1650_v55, %v3314_v21  ;;  %v1611_v12 = vpop.f32.mrb[45].mxu0  ;;  %v1652_v23 = vpop.f32.mrb[45].mxu1 }
 0x86d   :  { %v1658_v13 = vadd.f32 %v1611_v12, %v3315_v5  ;;  %v1660_v24 = vadd.f32 %v1652_v23, %v3316_v25  ;;  %v1613_v26 = vpop.f32.mrb[46].mxu0  ;;  %v1654_v35 = vpop.f32.mrb[46].mxu1 }
 0x86e   :  { %v2002_v27 = vmul.f32 -1.442695, %v1657_v20  ;;  %v1614_v0 = vpop.f32.mrb[47].mxu0  ;;  %v1655_v36 = vpop.f32.mrb[47].mxu1 }
 0x86f   :  { %v2003_v14 = vmul.f32 -1.442695, %v1658_v13  ;;  %v2004_v15 = vmul.f32 -1.442695, %v1660_v24 }
 0x870   :  { %2350 = vpow2.f32 %v2002_v27 }
 0x871   :  { %2352 = vpow2.f32 %v2003_v14 }
 0x872   :  { %2354 = vpow2.f32 %v2004_v15 }
 0x873   :  { %2356 = vtanh.f32 %v1659_v22 }
 0x87a   :  { %v2351_v16 = vpop.eup %2350 }
 0x87b   :  { %v2353_v17 = vpop.eup %2352  ;;  %v1664_v18 = vadd.f32 1.0, %v2351_v16 }
 0x87c   :  { %v1670_v31 = vadd.f32 1.0, %v2353_v17  ;;  %v2355_v33 = vpop.eup %2354 }
 0x87d   :  { %2358 = vrcp.f32 %v1664_v18  ;;  %v2357_v30 = vpop.eup %2356  ;;  %v1677_v19 = vadd.f32 1.0, %v2355_v33 }
 0x87e   :  { %2360 = vrcp.f32 %v1670_v31 }
 0x87f   :  { %2362 = vrcp.f32 %v1677_v19 }
 0x887   :  { %v2359_v46 = vpop.eup %2358 }
 0x888   :  { %v2361_v29 = vpop.eup %2360  ;;  %v1681_v56 = vmul.f32 %v2359_v46, %v2357_v30 }
 0x889   :  { %v1680_v1 = vmul.f32 %v2361_v29, %v1565_v54  ;;  %v2363_v28 = vpop.eup %2362 }
 0x88b   :  { %v1682_v4 = vadd.f32 %v1681_v56, %v1680_v1 }
 0x88d   :  { %2364 = vtanh.f32 %v1682_v4  ;;  %v1693_v37 = vsel %vm1691_vm15, %v1682_v4, %v1565_v54 }
 0x88e   :  { %1695 = vst [vmem:[#allocation3] sm:$0xff] %v1693_v37 }
 0x897   :  { %v2365_v61 = vpop.eup %2364 }
 0x898   :  { %v1684_v40 = vmul.f32 %v2365_v61, %v2363_v28 }
 0x89a   :  { %v1692_v41 = vsel %vm1691_vm15, %v1684_v40, %v1564_v58 }
 0x89b   :  { %1694 = vst [vmem:[#allocation2] sm:$0xff] %v1692_v41 }
 0x89c PF:  { %v1700_v42 = vld [vmem:[%s3267_s5] sm:$0xff]  ;;  %v1701_v43 = vld [vmem:[%s3267_s5 + $0x8] sm:$0xff]  ;;  %v1702_v44 = vld [vmem:[%s3267_s5 + $0x10] sm:$0xff]  ;;  %v2458_v45 = vmov 0.0|0.0   ;;  %vm2459_vm0 = vmmov 0   ;;  %v3317_v63 = vmov 0.0  }
 0x89d   :  { %2090 = vmatprep.subr.bf16.mxu0 %v2458_v45  ;;  %v2091_v47 = vpack.c.bf16 %v1701_v43, %v1700_v42  ;;  %v1703_v62 = vld [vmem:[%s3267_s5 + $0x18] sm:$0xff]  ;;  %2068 = vmatprep.mubr.msk.f32.mxu0 %vm2459_vm0, %v3317_v63  ;;  %v1704_v3 = vld [vmem:[%s3267_s5 + $0x20] sm:$0xff]  ;;  %v1705_v48 = vld [vmem:[%s3267_s5 + $0x28] sm:$0xff]  ;;  %vm1809_vm1 = vcmask 523264   ;;  %vm1889_vm2 = vcmask 7168  }
 0x89e   :  { %2114 = vmatprep.subr.bf16.mxu1 %v2458_v45  ;;  %2087 = vmatprep.mubr.msk.f32.mxu1 %vm2459_vm0, %v3317_v63  ;;  %v2094_v2 = vpack.c.bf16 %v1703_v62, %v1702_v44  ;;  %v1794_v6 = vld [vmem:[%s3269_s7] sm:$0xff]  ;;  %v1795_v49 = vld [vmem:[%s3269_s7 + $0x8] sm:$0xff]  ;;  %v1796_v7 = vld [vmem:[%s3269_s7 + $0x10] sm:$0xff]  ;;  %v2097_v8 = vpack.c.bf16 %v1705_v48, %v1704_v3 }
 0x89f   :  { %2092 = vmatpush3.bf16.msra.mxu0 %v2091_v47  ;;  %v1797_v50 = vld [vmem:[%s3269_s7 + $0x18] sm:$0xff]  ;;  %v2115_v51 = vpack.c.bf16 %v1795_v49, %v1794_v6  ;;  %v1706_v9 = vld [vmem:[%s3267_s5 + $0x30] sm:$0xff]  ;;  %v1798_v53 = vld [vmem:[%s3269_s7 + $0x20] sm:$0xff] }
 0x8a0   :  { %2093 = vmatprep.subr.bf16.mxu0 %v2458_v45  ;;  %v1707_v52 = vld [vmem:[%s3267_s5 + $0x38] sm:$0xff]  ;;  %v2118_v10 = vpack.c.bf16 %v1797_v50, %v1796_v7  ;;  %v1799_v11 = vld [vmem:[%s3269_s7 + $0x28] sm:$0xff]  ;;  %v1708_v38 = vld [vmem:[%s3267_s5 + $0x40] sm:$0xff] }
 0x8a1   :  { %2116 = vmatpush3.bf16.msra.mxu1 %v2115_v51  ;;  %v2100_v54 = vpack.c.bf16 %v1707_v52, %v1706_v9  ;;  %v1709_v39 = vld [vmem:[%s3267_s5 + $0x48] sm:$0xff]  ;;  %v2121_v57 = vpack.c.bf16 %v1799_v11, %v1798_v53  ;;  %v1710_v59 = vld [vmem:[%s3267_s5 + $0x50] sm:$0xff]  ;;  %v1711_v60 = vld [vmem:[%s3267_s5 + $0x58] sm:$0xff] }
 0x8a2   :  { %2117 = vmatprep.subr.bf16.mxu1 %v2458_v45  ;;  %v2103_v58 = vpack.c.bf16 %v1709_v39, %v1708_v38  ;;  %v2106_v55 = vpack.c.bf16 %v1711_v60, %v1710_v59  ;;  %v1712_v32 = vld [vmem:[%s3267_s5 + $0x60] sm:$0xff]  ;;  %v1713_v20 = vld [vmem:[%s3267_s5 + $0x68] sm:$0xff]  ;;  %v1714_v22 = vld [vmem:[%s3267_s5 + $0x70] sm:$0xff] }
 0x8a3   :  { %2095 = vmatpush3.bf16.msra.mxu0 %v2094_v2  ;;  %v2109_v21 = vpack.c.bf16 %v1713_v20, %v1712_v32  ;;  %v1715_v12 = vld [vmem:[%s3267_s5 + $0x78] sm:$0xff]  ;;  %v1699_v5 = vld [vmem:[#allocation2] sm:$0xff]  ;;  %v1800_v13 = vld [vmem:[%s3269_s7 + $0x30] sm:$0xff] }
 0x8a4   :  { %2096 = vmatprep.subr.bf16.mxu0 %v2458_v45  ;;  %v2112_v23 = vpack.c.bf16 %v1715_v12, %v1714_v22  ;;  %v1801_v25 = vld [vmem:[%s3269_s7 + $0x38] sm:$0xff]  ;;  %v2006_v26 = vld [vmem:[%s3268_s6] ss:$0 sm:$0xff]  ;;  %v2007_v14 = vld [vmem:[#allocation7] ss:$0 sm:$0xff] }
 0x8a5   :  { %2119 = vmatpush3.bf16.msra.mxu1 %v2118_v10  ;;  %v2124_v24 = vpack.c.bf16 %v1801_v25, %v1800_v13 }
 0x8a6   :  { %2120 = vmatprep.subr.bf16.mxu1 %v2458_v45 }
 0x8a7   :  { %2098 = vmatpush3.bf16.msra.mxu0 %v2097_v8 }
 0x8a8   :  { %2099 = vmatprep.subr.bf16.mxu0 %v2458_v45 }
 0x8a9   :  { %2122 = vmatpush3.bf16.msra.mxu1 %v2121_v57 }
 0x8aa   :  { %2123 = vmatprep.subr.bf16.mxu1 %v2458_v45 }
 0x8ab   :  { %2101 = vmatpush3.bf16.msra.mxu0 %v2100_v54 }
 0x8ac   :  { %2102 = vmatprep.subr.bf16.mxu0 %v2458_v45 }
 0x8ad   :  { %2125 = vmatpush3.bf16.msra.mxu1 %v2124_v24 }
 0x8af   :  { %2104 = vmatpush3.bf16.msra.mxu0 %v2103_v58 }
 0x8b0   :  { %2105 = vmatprep.subr.bf16.mxu0 %v2458_v45 }
 0x8b3   :  { %2107 = vmatpush3.bf16.msra.mxu0 %v2106_v55 }
 0x8b4   :  { %2108 = vmatprep.subr.bf16.mxu0 %v2458_v45 }
 0x8b7   :  { %2110 = vmatpush3.bf16.msra.mxu0 %v2109_v21 }
 0x8b8   :  { %2111 = vmatprep.subr.bf16.mxu0 %v2458_v45 }
 0x8bb   :  { %2113 = vmatpush3.bf16.msra.mxu0 %v2112_v23 }
 0x8be   :  { %2069 = vmatmul.mubr.f32.vlgmr.msra.gmra.mrb[0].mxu0 %v1699_v5 }
 0x991   :  { %v1789_v35 = vpop.f32.mrb[0].mxu0 }
 0x992   :  { %v1790_v27 = vadd.f32 %v2006_v26, %v1789_v35  ;;  %v2070_v0 = vpop.f32.mrb[1].mxu0 }
 0x994   :  { %v1793_v36 = vmax.f32 %v1790_v27, 0.0 }
 0x996   :  { %2088 = vmatmul.mubr.msk.f32.vlgmr.msra.gmra.mrb[0].mxu1 %vm1809_vm1, %v1793_v36 }
 0xa69   :  { %v1879_v15 = vpop.f32.mrb[0].mxu1 }
 0xa6a   :  { %v1880_v16 = vadd.f32 %v2007_v14, %v1879_v15  ;;  %v2089_v17 = vpop.f32.mrb[1].mxu1 }
 0xa6c   :  { %v2009_v18 = vmul.f32 -1.442695, %v1880_v16 }
 0xa6e   :  { %2398 = vpow2.f32 %v2009_v18 }
 0xa78   :  { %v2399_v31 = vpop.eup %2398 }
 0xa79   :  { %v1886_v33 = vadd.f32 1.0, %v2399_v31 }
 0xa7b   :  { %2400 = vrcp.f32 %v1886_v33 }
 0xa85   :  { %v2401_v30 = vpop.eup %2400 }
 0xa86   :  { %1890 = vst.msk [vmem:[%s3271_s9] sm:$0xff] %vm1889_vm2, %v2401_v30 }
 0xa87   :  { %1895 = vsyncpa [#allocation9], 1 }
 0xa88   :  { %1896 = vsyncpa [#allocation11], 1 }

</bundles_post_ra>
